<compile_context>
chip_gen: v7x
topology: tpu7x:2x2x1
jax: 0.10.0
libtpu: 0.0.40
codegen_flags: <defaults>
</compile_context>

<pallas_src>
import functools

import jax
import jax.numpy as jnp
from jax.experimental import pallas as pl
from jax.experimental.pallas import tpu as pltpu


def _offsets(k):
    r = k // 2
    return tuple((kh - r, kw - r) for kh in range(k) for kw in range(k))


# ----------------------------------------------------------------------------
# Fused Pallas kernel (one batch element — or the whole folded batch — per step)
# ----------------------------------------------------------------------------
def _tag_fused_kernel(x_ref, pred_ref, masks_ref,
                      wbr_ref, bbr_ref, win_ref, bin_ref,
                      wmid_ref, bmid_ref, wout_ref, bout_ref,
                      o_ref, *, W, L, depth, ksize, kout,
                      mask_offsets, mxu_dtype):
    """Fused TAG forward.

    x_ref    : [1, cin_p, L]        input features (channels on sublanes,
                                     flattened spatial (x batch) on lanes)
    pred_ref : [1, 1, L]            bilinear-upsampled prediction logits
    masks_ref: [n_off, L] f32 0/1   per-offset zero-padding masks
    wbr_ref  : [3, c3_p, 9*cin_p]   branch conv weights (fg, bg, bd), packed
    bbr_ref  : [3, c3_p, 1]
    win_ref  : [ch_p, 3*c3_p]       conv_in (1x1) weight (concat fused)
    bin_ref  : [ch_p, 1]
    wmid_ref : [depth, ch_p, k*k*ch_p]
    bmid_ref : [depth, ch_p, 1]
    wout_ref : [1, kout*kout*ch_p]
    bout_ref : [1, 1]
    o_ref    : [1, 1, L]            conv_out(...) + pred
    """
    f32 = jnp.float32

    # ---- hoisted boundary masks: each row loaded exactly once ------------
    mask_rows = {off: masks_ref[pl.ds(i, 1), :]          # [1, L]
                 for i, off in enumerate(mask_offsets) if off != (0, 0)}

    def rolled(v, dy, dx):
        s = dy * W + dx
        return v if s == 0 else pltpu.roll(v, shift=(-s) % L, axis=1)

    def shifted_masked(v, dy, dx):
        # out[:, p] = v[:, p + dy*W + dx] inside the image, else 0.
        sv = rolled(v, dy, dx)
        return sv if (dy, dx) == (0, 0) else sv * mask_rows[(dy, dx)]

    def mdot(w, v):
        # w: [cout_p, K] (already mxu_dtype);  v: [K, L] f32 -> cast once.
        return jax.lax.dot_general(
            w, v.astype(mxu_dtype),
            dimension_numbers=(((1,), (0,)), ((), ())),
            preferred_element_type=f32)

    def conv_im2col(v, k, w, bias, relu):
        # v: [ch_p, L].  One MXU dot over the aligned im2col stack.
        taps = [shifted_masked(v, dy, dx) for dy, dx in _offsets(k)]
        stack = taps[0] if len(taps) == 1 else jnp.concatenate(taps, axis=0)
        y = mdot(w, stack) + bias.astype(f32)
        return jnp.maximum(y, 0.0) if relu else y

    # ---- attention gating (sigmoid / clip / abs; VPU + EUP, f32) ---------
    xv = x_ref[0].astype(f32)                 # [cin_p, L]
    pr = pred_ref[0].astype(f32)              # [1,  L]
    p = jax.nn.sigmoid(pr) - 0.5

    # ---- branch stage: shared shifted feature taps ------------------------
    fg_t, bg_t, bd_t = [], [], []
    for dy, dx in _offsets(3):
        sx = shifted_masked(xv, dy, dx)       # one expensive roll per offset
        sp = rolled(p, dy, dx)                # cheap 1-row roll; mask via sx
        fg_t.append(sx * jnp.clip(sp, 0.0, 1.0))
        bg_t.append(sx * jnp.clip(-sp, 0.0, 1.0))
        bd_t.append(sx * (0.5 - jnp.abs(sp)))

    # Conv3x3 + folded BN + ReLU per branch (Dropout2d == identity, eval).
    branches = []
    for b, taps in enumerate((fg_t, bg_t, bd_t)):
        stack = jnp.concatenate(taps, axis=0)             # [9*cin_p, L], f32
        y = mdot(wbr_ref[b], stack) + bbr_ref[b].astype(f32)
        branches.append(jnp.maximum(y, 0.0))              # [c3_p, L]

    # ---- concat + conv_in (1x1) as ONE dot --------------------------------
    cat = jnp.concatenate(branches, axis=0)               # [3*c3_p, L]
    out = mdot(win_ref[...], cat) + bin_ref[...].astype(f32)   # [ch_p, L]

    # ---- conv_mid chain (explicit F.relu in the reference forward) --------
    for i in range(depth):
        out = conv_im2col(out, ksize, wmid_ref[i], bmid_ref[i], relu=True)

    # ---- conv_out (single combined dot) + residual ------------------------
    res = conv_im2col(out, kout, wout_ref[...], bout_ref[...], relu=False)
    o_ref[...] = (res + pr)[None].astype(o_ref.dtype)


# ----------------------------------------------------------------------------
# Wrapper
# ----------------------------------------------------------------------------
def tag_forward(params, x_nchw, pred_nchw, *, depth, kernel_size=3,
                fold_batch=False, mxu_dtype=jnp.bfloat16):
    """TAG forward. Returns (x, out) like the PyTorch module (NCHW in/out)."""
    N, Cin, H, W = x_nchw.shape
    assert kernel_size % 2 == 1, "only odd kernel sizes are supported"
    c3 = Cin // 3
    channel = params["b_in"].shape[0]
    HW = H * W
    kk = kernel_size * kernel_size
    kout = 3 if kernel_size == 3 else 1

    def rup8(v):
        return (v + 7) // 8 * 8
    cin_p, c3_p, ch_p = rup8(Cin), rup8(c3), rup8(channel)

    # F.interpolate(pred, size=(H, W), bilinear, align_corners=False)
    pred_up = jax.image.resize(pred_nchw.astype(jnp.float32), (N, 1, H, W),
                               method="bilinear")

    # ---- hoisted boundary masks (one 0/1 row per distinct offset) ---------
    all_offs = tuple(dict.fromkeys(_offsets(3) + _offsets(kernel_size)
                                   + _offsets(kout)))
    pix = jnp.arange(HW, dtype=jnp.int32)
    row, col = pix // W, pix % W
    masks = jnp.stack([(((row + dy) >= 0) & ((row + dy) < H) &
                        ((col + dx) >= 0) & ((col + dx) < W))
                       .astype(jnp.float32) for (dy, dx) in all_offs])

    # ---- wrapper-side weight packing: contiguous MXU slabs ----------------
    # [k*k, cout, cin] -> [cout_pad, k*k*cin_pad]  (8-padded so every in-kernel
    # sublane concat is tile aligned); operands cast to mxu_dtype.
    def pack(w_taps, cout_p, cin_pp):
        kk_, cout, cin = w_taps.shape
        w = jnp.zeros((cout_p, kk_, cin_pp), jnp.float32)
        w = w.at[:cout, :, :cin].set(jnp.transpose(w_taps, (1, 0, 2)))
        return w.reshape(cout_p, kk_ * cin_pp).astype(mxu_dtype)

    w_br = jnp.stack([pack(params["w_br"][b], c3_p, cin_p) for b in range(3)])
    b_br = jnp.pad(params["b_br"], ((0, 0), (0, c3_p - c3), (0, 0)))
    w_in = jnp.zeros((ch_p, 3, c3_p), jnp.float32)
    w_in = w_in.at[:channel, :, :c3].set(jnp.transpose(params["w_in"], (1, 0, 2)))
    w_in = w_in.reshape(ch_p, 3 * c3_p).astype(mxu_dtype)
    b_in = jnp.pad(params["b_in"], ((0, ch_p - channel), (0, 0)))
    w_mid = jnp.stack([pack(params["w_mid"][i], ch_p, ch_p) for i in range(depth)])
    b_mid = jnp.pad(params["b_mid"], ((0, 0), (0, ch_p - channel), (0, 0)))
    w_out = pack(params["w_out"], 1, ch_p)
    b_out = params["b_out"]

    # ---- activation layout -------------------------------------------------
    if fold_batch:
        # Batch folded into the lane axis: [C, N*H*W], grid=(1,)  (v5e/v6e).
        nb, L = 1, N * HW
        x_in = jnp.transpose(x_nchw.reshape(N, Cin, HW), (1, 0, 2)).reshape(1, Cin, L)
        pred_in = pred_up.reshape(1, 1, L)
        masks_in = jnp.tile(masks, (1, N))
    else:
        # One image per grid step, "parallel" over batch (v7x: 2 TensorCores).
        nb, L = N, HW
        x_in = x_nchw.reshape(N, Cin, HW)
        pred_in = pred_up.reshape(N, 1, HW)
        masks_in = masks
    x_in = jnp.pad(x_in, ((0, 0), (0, cin_p - Cin), (0, 0)))

    kernel = functools.partial(
        _tag_fused_kernel, W=W, L=L, depth=depth, ksize=kernel_size,
        kout=kout, mask_offsets=all_offs, mxu_dtype=mxu_dtype)

    out_flat = pl.pallas_call(
        kernel,
        out_shape=jax.ShapeDtypeStruct((nb, 1, L), x_nchw.dtype),
        grid=(nb,),
        in_specs=[
            pl.BlockSpec((1, cin_p, L), lambda n: (n, 0, 0)),
            pl.BlockSpec((1, 1, L), lambda n: (n, 0, 0)),
            pl.BlockSpec((len(all_offs), L), lambda n: (0, 0)),
            pl.BlockSpec((3, c3_p, 9 * cin_p), lambda n: (0, 0, 0)),
            pl.BlockSpec((3, c3_p, 1), lambda n: (0, 0, 0)),
            pl.BlockSpec((ch_p, 3 * c3_p), lambda n: (0, 0)),
            pl.BlockSpec((ch_p, 1), lambda n: (0, 0)),
            pl.BlockSpec((depth, ch_p, kk * ch_p), lambda n: (0, 0, 0)),
            pl.BlockSpec((depth, ch_p, 1), lambda n: (0, 0, 0)),
            pl.BlockSpec((1, kout * kout * ch_p), lambda n: (0, 0)),
            pl.BlockSpec((1, 1), lambda n: (0, 0)),
        ],
        out_specs=pl.BlockSpec((1, 1, L), lambda n: (n, 0, 0)),
        compiler_params=pltpu.CompilerParams(
            dimension_semantics=("parallel",)),
    )(x_in, pred_in, masks_in, w_br, b_br, w_in, b_in, w_mid, b_mid,
      w_out, b_out)

    return x_nchw, out_flat.reshape(N, 1, H, W)


# ----------------------------------------------------------------------------
# Parameter init (deterministic, synthetic) + BN folding
# ----------------------------------------------------------------------------
def _fold_bn(w_taps, b, gamma, beta, mean, var, eps=1e-5):
    # w_taps: [k*k, cout, cin]; BatchNorm2d (eval) folded into conv w/b.
    scale = gamma / jnp.sqrt(var + eps)
    return w_taps * scale[None, :, None], (b - mean) * scale + beta


def _conv_taps(key, kk, cout, cin, scale=0.1):
    kw, kb = jax.random.split(key)
    w = jax.random.normal(kw, (kk, cout, cin), jnp.float32) * scale
    b = jax.random.normal(kb, (cout,), jnp.float32) * scale
    return w, b


def _branch_params(key, cin, cout):
    """Conv3x3 + BatchNorm2d (eval) folded together."""
    kc, kg, kbeta, km, kv = jax.random.split(key, 5)
    w, b = _conv_taps(kc, 9, cout, cin)
    gamma = jax.random.uniform(kg, (cout,), jnp.float32, 0.5, 1.5)
    beta = jax.random.normal(kbeta, (cout,), jnp.float32) * 0.1
    mean = jax.random.normal(km, (cout,), jnp.float32) * 0.1
    var = jax.random.uniform(kv, (cout,), jnp.float32, 0.5, 1.5)
    return _fold_bn(w, b, gamma, beta, mean, var)


def init_params(key, in_channels, channel, depth, kernel_size):
    c3 = in_channels // 3
    kk = kernel_size * kernel_size
    kout = 3 if kernel_size == 3 else 1
    keys = jax.random.split(key, 5 + depth)

    wbr, bbr = zip(*(_branch_params(keys[i], in_channels, c3) for i in range(3)))
    p = {"w_br": jnp.stack(wbr), "b_br": jnp.stack(bbr)[..., None]}

    w_in, b_in = _conv_taps(keys[3], 1, channel, 3 * c3)
    # Stored split per branch: [channel, 3*c3] -> [3, channel, c3].
    p["w_in"] = jnp.transpose(w_in[0].reshape(channel, 3, c3), (1, 0, 2))
    p["b_in"] = b_in[:, None]

    wm, bm = zip(*(_conv_taps(keys[4 + i], kk, channel, channel)
                   for i in range(depth)))
    p["w_mid"] = jnp.stack(wm)
    p["b_mid"] = jnp.stack(bm)[..., None]

    w_out, b_out = _conv_taps(keys[4 + depth], kout * kout, 1, channel)
    p["w_out"] = w_out
    p["b_out"] = b_out[:, None]
    return p


# ----------------------------------------------------------------------------
# Pure-JAX (XLA) reference of the same forward pass, NCHW — for validation.
# ----------------------------------------------------------------------------
def _ref_forward(params, x, pred, depth, kernel_size):
    N, Cin, H, W = x.shape
    c3 = Cin // 3
    channel = params["b_in"].shape[0]
    hi = jax.lax.Precision.HIGHEST

    pred_up = jax.image.resize(pred, (N, 1, H, W), method="bilinear")
    p = jax.nn.sigmoid(pred_up) - 0.5
    atts = (jnp.clip(p, 0.0, 1.0), jnp.clip(-p, 0.0, 1.0), 0.5 - jnp.abs(p))

    def conv(v, w_taps, bias, k):
        kk, cout, cin = w_taps.shape
        w = jnp.transpose(w_taps.reshape(k, k, cout, cin), (2, 3, 0, 1))
        y = jax.lax.conv_general_dilated(
            v, w, window_strides=(1, 1), padding=[(k // 2, k // 2)] * 2,
            dimension_numbers=("NCHW", "OIHW", "NCHW"), precision=hi)
        return y + bias.reshape(1, cout, 1, 1)

    branch = [jax.nn.relu(conv(x * att, params["w_br"][b],
                               params["b_br"][b, :, 0], 3))
              for b, att in enumerate(atts)]
    cat = jnp.concatenate(branch, axis=1)                     # [N, 3*c3, H, W]
    w_in = jnp.transpose(params["w_in"], (1, 0, 2)).reshape(channel, 3 * c3)
    out = (jnp.einsum("oc,nchw->nohw", w_in, cat, precision=hi)
           + params["b_in"].reshape(1, channel, 1, 1))
    for i in range(depth):
        out = jax.nn.relu(conv(out, params["w_mid"][i],
                               params["b_mid"][i, :, 0], kernel_size))
    kout = 3 if kernel_size == 3 else 1
    out = conv(out, params["w_out"], params["b_out"][:, 0], kout)
    return x, out + pred_up


# ----------------------------------------------------------------------------
if __name__ == "__main__":
    in_channels, channel, depth, kernel_size = 6, 8, 3, 3
    N, H, W = 2, 16, 16

    key = jax.random.PRNGKey(0)
    kx, kp, kparams = jax.random.split(key, 3)
    x = jax.random.normal(kx, (N, in_channels, H, W), jnp.float32)
    pred = jax.random.normal(kp, (N, 1, H // 2, W // 2), jnp.float32)

    params = init_params(kparams, in_channels, channel, depth, kernel_size)
    _, ref = _ref_forward(params, x, pred, depth, kernel_size)

    # Config A (v7x-friendly): grid=(N,) "parallel" (2 TensorCores), f32 MXU
    # operands -> strict check of the fused im2col structure.
    fwd_a = jax.jit(functools.partial(tag_forward, depth=depth,
                                      kernel_size=kernel_size,
                                      fold_batch=False, mxu_dtype=jnp.float32))
    x_a, out_a = fwd_a(params, x, pred)
    jax.block_until_ready((x_a, out_a))
    assert x_a.shape == (N, in_channels, H, W)
    assert out_a.shape == (N, 1, H, W)
    assert jnp.all(jnp.isfinite(out_a))
    err_a = float(jnp.max(jnp.abs(out_a - ref)))
    assert err_a < 1e-3, f"f32 config: max abs diff vs reference = {err_a}"

    # Config B (v5e/v6e-friendly): batch folded into the lane axis (grid=(1,),
    # lane-dense [1, N*H*W] output), bf16 MXU operands / f32 accumulate.
    fwd_b = jax.jit(functools.partial(tag_forward, depth=depth,
                                      kernel_size=kernel_size,
                                      fold_batch=True, mxu_dtype=jnp.bfloat16))
    x_b, out_b = fwd_b(params, x, pred)
    jax.block_until_ready((x_b, out_b))
    assert out_b.shape == (N, 1, H, W)
    assert jnp.all(jnp.isfinite(out_b))
    err_b = float(jnp.max(jnp.abs(out_b - ref)))
    # Tolerance loosened deliberately for bf16 MXU operands (per perf review).
    assert err_b < 3e-2, f"bf16 config: max abs diff vs reference = {err_b}"

    print("KERNEL_OK")
</pallas_src>

<mosaic_0001>
module attributes {stable_mosaic.version = 11 : i64} {
  func.func @_tag_fused_kernel(%arg0: i32, %arg1: memref<1x8x256xf32, #tpu.memory_space<vmem>>, %arg2: memref<1x1x256xf32, #tpu.memory_space<vmem>>, %arg3: memref<9x256xf32, #tpu.memory_space<vmem>>, %arg4: memref<3x8x72xf32, #tpu.memory_space<vmem>>, %arg5: memref<3x8x1xf32, #tpu.memory_space<vmem>>, %arg6: memref<8x24xf32, #tpu.memory_space<vmem>>, %arg7: memref<8x1xf32, #tpu.memory_space<vmem>>, %arg8: memref<3x8x72xf32, #tpu.memory_space<vmem>>, %arg9: memref<3x8x1xf32, #tpu.memory_space<vmem>>, %arg10: memref<1x72xf32, #tpu.memory_space<vmem>>, %arg11: memref<1x1xf32, #tpu.memory_space<vmem>>, %arg12: memref<1x1x256xf32, #tpu.memory_space<vmem>>) attributes {dimension_semantics = [#tpu.dimension_semantics<parallel>], iteration_bounds = array<i64: 2>, scalar_prefetch = 0 : i64, scratch_operands = 0 : i64, tpu.core_type = #tpu.core_type<tc>, window_params = [{transform_indices = @transform_0, window_bounds = array<i64: 1, 8, 256>}, {transform_indices = @transform_1, window_bounds = array<i64: 1, 1, 256>}, {pipeline_mode = #tpu.pipeline_mode<synchronous>, transform_indices = @transform_2, window_bounds = array<i64: 9, 256>}, {pipeline_mode = #tpu.pipeline_mode<synchronous>, transform_indices = @transform_3, window_bounds = array<i64: 3, 8, 72>}, {pipeline_mode = #tpu.pipeline_mode<synchronous>, transform_indices = @transform_4, window_bounds = array<i64: 3, 8, 1>}, {pipeline_mode = #tpu.pipeline_mode<synchronous>, transform_indices = @transform_5, window_bounds = array<i64: 8, 24>}, {pipeline_mode = #tpu.pipeline_mode<synchronous>, transform_indices = @transform_6, window_bounds = array<i64: 8, 1>}, {pipeline_mode = #tpu.pipeline_mode<synchronous>, transform_indices = @transform_7, window_bounds = array<i64: 3, 8, 72>}, {pipeline_mode = #tpu.pipeline_mode<synchronous>, transform_indices = @transform_8, window_bounds = array<i64: 3, 8, 1>}, {pipeline_mode = #tpu.pipeline_mode<synchronous>, transform_indices = @transform_9, window_bounds = array<i64: 1, 72>}, {pipeline_mode = #tpu.pipeline_mode<synchronous>, transform_indices = @transform_10, window_bounds = array<i64: 1, 1>}, {transform_indices = @transform_11, window_bounds = array<i64: 1, 1, 256>}]} {
    %c0 = arith.constant 0 : index
    %c0_0 = arith.constant 0 : index
    %0 = vector.load %arg3[%c0, %c0_0] : memref<9x256xf32, #tpu.memory_space<vmem>>, vector<1x256xf32>
    %c1 = arith.constant 1 : index
    %c0_1 = arith.constant 0 : index
    %1 = vector.load %arg3[%c1, %c0_1] : memref<9x256xf32, #tpu.memory_space<vmem>>, vector<1x256xf32>
    %c2 = arith.constant 2 : index
    %c0_2 = arith.constant 0 : index
    %2 = vector.load %arg3[%c2, %c0_2] : memref<9x256xf32, #tpu.memory_space<vmem>>, vector<1x256xf32>
    %c3 = arith.constant 3 : index
    %c0_3 = arith.constant 0 : index
    %3 = vector.load %arg3[%c3, %c0_3] : memref<9x256xf32, #tpu.memory_space<vmem>>, vector<1x256xf32>
    %c5 = arith.constant 5 : index
    %c0_4 = arith.constant 0 : index
    %4 = vector.load %arg3[%c5, %c0_4] : memref<9x256xf32, #tpu.memory_space<vmem>>, vector<1x256xf32>
    %c6 = arith.constant 6 : index
    %c0_5 = arith.constant 0 : index
    %5 = vector.load %arg3[%c6, %c0_5] : memref<9x256xf32, #tpu.memory_space<vmem>>, vector<1x256xf32>
    %c7 = arith.constant 7 : index
    %c0_6 = arith.constant 0 : index
    %6 = vector.load %arg3[%c7, %c0_6] : memref<9x256xf32, #tpu.memory_space<vmem>>, vector<1x256xf32>
    %c8 = arith.constant 8 : index
    %c0_7 = arith.constant 0 : index
    %7 = vector.load %arg3[%c8, %c0_7] : memref<9x256xf32, #tpu.memory_space<vmem>>, vector<1x256xf32>
    %c0_8 = arith.constant 0 : index
    %c0_9 = arith.constant 0 : index
    %c0_10 = arith.constant 0 : index
    %8 = vector.load %arg1[%c0_8, %c0_9, %c0_10] : memref<1x8x256xf32, #tpu.memory_space<vmem>>, vector<1x8x256xf32>
    %9 = vector.shape_cast %8 : vector<1x8x256xf32> to vector<8x256xf32>
    %c0_11 = arith.constant 0 : index
    %c0_12 = arith.constant 0 : index
    %c0_13 = arith.constant 0 : index
    %10 = vector.load %arg2[%c0_11, %c0_12, %c0_13] : memref<1x1x256xf32, #tpu.memory_space<vmem>>, vector<1x1x256xf32>
    %11 = vector.shape_cast %10 : vector<1x1x256xf32> to vector<1x256xf32>
    %12 = arith.negf %11 : vector<1x256xf32>
    %13 = math.exp %12 : vector<1x256xf32>
    %cst = arith.constant 1.000000e+00 : f32
    %14 = vector.broadcast %cst : f32 to vector<1x256xf32>
    %15 = arith.addf %14, %13 : vector<1x256xf32>
    %16 = arith.divf %14, %15 : vector<1x256xf32>
    %cst_14 = arith.constant 5.000000e-01 : f32
    %17 = vector.broadcast %cst_14 : f32 to vector<1x256xf32>
    %18 = arith.subf %16, %17 : vector<1x256xf32>
    %c17_i32 = arith.constant 17 : i32
    %19 = tpu.dynamic_rotate %9 by %c17_i32 dim 1 : vector<8x256xf32>, i32 -> vector<8x256xf32>
    %20 = vector.broadcast %0 : vector<1x256xf32> to vector<8x256xf32>
    %21 = arith.mulf %19, %20 : vector<8x256xf32>
    %c17_i32_15 = arith.constant 17 : i32
    %22 = tpu.dynamic_rotate %18 by %c17_i32_15 dim 1 : vector<1x256xf32>, i32 -> vector<1x256xf32>
    %cst_16 = arith.constant 0.000000e+00 : f32
    %cst_17 = arith.constant 1.000000e+00 : f32
    %23 = vector.broadcast %cst_16 : f32 to vector<1x256xf32>
    %24 = arith.maximumf %23, %22 : vector<1x256xf32>
    %25 = vector.broadcast %cst_17 : f32 to vector<1x256xf32>
    %26 = arith.minimumf %25, %24 : vector<1x256xf32>
    %27 = vector.broadcast %26 : vector<1x256xf32> to vector<8x256xf32>
    %28 = arith.mulf %21, %27 : vector<8x256xf32>
    %cst_18 = arith.constant 0.000000e+00 : f32
    %29 = vector.broadcast %cst_18 : f32 to vector<1x256xf32>
    %30 = arith.subf %29, %22 : vector<1x256xf32>
    %cst_19 = arith.constant 0.000000e+00 : f32
    %cst_20 = arith.constant 1.000000e+00 : f32
    %31 = vector.broadcast %cst_19 : f32 to vector<1x256xf32>
    %32 = arith.maximumf %31, %30 : vector<1x256xf32>
    %33 = vector.broadcast %cst_20 : f32 to vector<1x256xf32>
    %34 = arith.minimumf %33, %32 : vector<1x256xf32>
    %35 = vector.broadcast %34 : vector<1x256xf32> to vector<8x256xf32>
    %36 = arith.mulf %21, %35 : vector<8x256xf32>
    %37 = math.absf %22 : vector<1x256xf32>
    %cst_21 = arith.constant 5.000000e-01 : f32
    %38 = vector.broadcast %cst_21 : f32 to vector<1x256xf32>
    %39 = arith.subf %38, %37 : vector<1x256xf32>
    %40 = vector.broadcast %39 : vector<1x256xf32> to vector<8x256xf32>
    %41 = arith.mulf %21, %40 : vector<8x256xf32>
    %c16_i32 = arith.constant 16 : i32
    %42 = tpu.dynamic_rotate %9 by %c16_i32 dim 1 : vector<8x256xf32>, i32 -> vector<8x256xf32>
    %43 = vector.broadcast %1 : vector<1x256xf32> to vector<8x256xf32>
    %44 = arith.mulf %42, %43 : vector<8x256xf32>
    %c16_i32_22 = arith.constant 16 : i32
    %45 = tpu.dynamic_rotate %18 by %c16_i32_22 dim 1 : vector<1x256xf32>, i32 -> vector<1x256xf32>
    %cst_23 = arith.constant 0.000000e+00 : f32
    %cst_24 = arith.constant 1.000000e+00 : f32
    %46 = vector.broadcast %cst_23 : f32 to vector<1x256xf32>
    %47 = arith.maximumf %46, %45 : vector<1x256xf32>
    %48 = vector.broadcast %cst_24 : f32 to vector<1x256xf32>
    %49 = arith.minimumf %48, %47 : vector<1x256xf32>
    %50 = vector.broadcast %49 : vector<1x256xf32> to vector<8x256xf32>
    %51 = arith.mulf %44, %50 : vector<8x256xf32>
    %cst_25 = arith.constant 0.000000e+00 : f32
    %52 = vector.broadcast %cst_25 : f32 to vector<1x256xf32>
    %53 = arith.subf %52, %45 : vector<1x256xf32>
    %cst_26 = arith.constant 0.000000e+00 : f32
    %cst_27 = arith.constant 1.000000e+00 : f32
    %54 = vector.broadcast %cst_26 : f32 to vector<1x256xf32>
    %55 = arith.maximumf %54, %53 : vector<1x256xf32>
    %56 = vector.broadcast %cst_27 : f32 to vector<1x256xf32>
    %57 = arith.minimumf %56, %55 : vector<1x256xf32>
    %58 = vector.broadcast %57 : vector<1x256xf32> to vector<8x256xf32>
    %59 = arith.mulf %44, %58 : vector<8x256xf32>
    %60 = math.absf %45 : vector<1x256xf32>
    %cst_28 = arith.constant 5.000000e-01 : f32
    %61 = vector.broadcast %cst_28 : f32 to vector<1x256xf32>
    %62 = arith.subf %61, %60 : vector<1x256xf32>
    %63 = vector.broadcast %62 : vector<1x256xf32> to vector<8x256xf32>
    %64 = arith.mulf %44, %63 : vector<8x256xf32>
    %c15_i32 = arith.constant 15 : i32
    %65 = tpu.dynamic_rotate %9 by %c15_i32 dim 1 : vector<8x256xf32>, i32 -> vector<8x256xf32>
    %66 = vector.broadcast %2 : vector<1x256xf32> to vector<8x256xf32>
    %67 = arith.mulf %65, %66 : vector<8x256xf32>
    %c15_i32_29 = arith.constant 15 : i32
    %68 = tpu.dynamic_rotate %18 by %c15_i32_29 dim 1 : vector<1x256xf32>, i32 -> vector<1x256xf32>
    %cst_30 = arith.constant 0.000000e+00 : f32
    %cst_31 = arith.constant 1.000000e+00 : f32
    %69 = vector.broadcast %cst_30 : f32 to vector<1x256xf32>
    %70 = arith.maximumf %69, %68 : vector<1x256xf32>
    %71 = vector.broadcast %cst_31 : f32 to vector<1x256xf32>
    %72 = arith.minimumf %71, %70 : vector<1x256xf32>
    %73 = vector.broadcast %72 : vector<1x256xf32> to vector<8x256xf32>
    %74 = arith.mulf %67, %73 : vector<8x256xf32>
    %cst_32 = arith.constant 0.000000e+00 : f32
    %75 = vector.broadcast %cst_32 : f32 to vector<1x256xf32>
    %76 = arith.subf %75, %68 : vector<1x256xf32>
    %cst_33 = arith.constant 0.000000e+00 : f32
    %cst_34 = arith.constant 1.000000e+00 : f32
    %77 = vector.broadcast %cst_33 : f32 to vector<1x256xf32>
    %78 = arith.maximumf %77, %76 : vector<1x256xf32>
    %79 = vector.broadcast %cst_34 : f32 to vector<1x256xf32>
    %80 = arith.minimumf %79, %78 : vector<1x256xf32>
    %81 = vector.broadcast %80 : vector<1x256xf32> to vector<8x256xf32>
    %82 = arith.mulf %67, %81 : vector<8x256xf32>
    %83 = math.absf %68 : vector<1x256xf32>
    %cst_35 = arith.constant 5.000000e-01 : f32
    %84 = vector.broadcast %cst_35 : f32 to vector<1x256xf32>
    %85 = arith.subf %84, %83 : vector<1x256xf32>
    %86 = vector.broadcast %85 : vector<1x256xf32> to vector<8x256xf32>
    %87 = arith.mulf %67, %86 : vector<8x256xf32>
    %c1_i32 = arith.constant 1 : i32
    %88 = tpu.dynamic_rotate %9 by %c1_i32 dim 1 : vector<8x256xf32>, i32 -> vector<8x256xf32>
    %89 = vector.broadcast %3 : vector<1x256xf32> to vector<8x256xf32>
    %90 = arith.mulf %88, %89 : vector<8x256xf32>
    %c1_i32_36 = arith.constant 1 : i32
    %91 = tpu.dynamic_rotate %18 by %c1_i32_36 dim 1 : vector<1x256xf32>, i32 -> vector<1x256xf32>
    %cst_37 = arith.constant 0.000000e+00 : f32
    %cst_38 = arith.constant 1.000000e+00 : f32
    %92 = vector.broadcast %cst_37 : f32 to vector<1x256xf32>
    %93 = arith.maximumf %92, %91 : vector<1x256xf32>
    %94 = vector.broadcast %cst_38 : f32 to vector<1x256xf32>
    %95 = arith.minimumf %94, %93 : vector<1x256xf32>
    %96 = vector.broadcast %95 : vector<1x256xf32> to vector<8x256xf32>
    %97 = arith.mulf %90, %96 : vector<8x256xf32>
    %cst_39 = arith.constant 0.000000e+00 : f32
    %98 = vector.broadcast %cst_39 : f32 to vector<1x256xf32>
    %99 = arith.subf %98, %91 : vector<1x256xf32>
    %cst_40 = arith.constant 0.000000e+00 : f32
    %cst_41 = arith.constant 1.000000e+00 : f32
    %100 = vector.broadcast %cst_40 : f32 to vector<1x256xf32>
    %101 = arith.maximumf %100, %99 : vector<1x256xf32>
    %102 = vector.broadcast %cst_41 : f32 to vector<1x256xf32>
    %103 = arith.minimumf %102, %101 : vector<1x256xf32>
    %104 = vector.broadcast %103 : vector<1x256xf32> to vector<8x256xf32>
    %105 = arith.mulf %90, %104 : vector<8x256xf32>
    %106 = math.absf %91 : vector<1x256xf32>
    %cst_42 = arith.constant 5.000000e-01 : f32
    %107 = vector.broadcast %cst_42 : f32 to vector<1x256xf32>
    %108 = arith.subf %107, %106 : vector<1x256xf32>
    %109 = vector.broadcast %108 : vector<1x256xf32> to vector<8x256xf32>
    %110 = arith.mulf %90, %109 : vector<8x256xf32>
    %cst_43 = arith.constant 0.000000e+00 : f32
    %cst_44 = arith.constant 1.000000e+00 : f32
    %111 = vector.broadcast %cst_43 : f32 to vector<1x256xf32>
    %112 = arith.maximumf %111, %18 : vector<1x256xf32>
    %113 = vector.broadcast %cst_44 : f32 to vector<1x256xf32>
    %114 = arith.minimumf %113, %112 : vector<1x256xf32>
    %115 = vector.broadcast %114 : vector<1x256xf32> to vector<8x256xf32>
    %116 = arith.mulf %9, %115 : vector<8x256xf32>
    %cst_45 = arith.constant 0.000000e+00 : f32
    %117 = vector.broadcast %cst_45 : f32 to vector<1x256xf32>
    %118 = arith.subf %117, %18 : vector<1x256xf32>
    %cst_46 = arith.constant 0.000000e+00 : f32
    %cst_47 = arith.constant 1.000000e+00 : f32
    %119 = vector.broadcast %cst_46 : f32 to vector<1x256xf32>
    %120 = arith.maximumf %119, %118 : vector<1x256xf32>
    %121 = vector.broadcast %cst_47 : f32 to vector<1x256xf32>
    %122 = arith.minimumf %121, %120 : vector<1x256xf32>
    %123 = vector.broadcast %122 : vector<1x256xf32> to vector<8x256xf32>
    %124 = arith.mulf %9, %123 : vector<8x256xf32>
    %125 = math.absf %18 : vector<1x256xf32>
    %cst_48 = arith.constant 5.000000e-01 : f32
    %126 = vector.broadcast %cst_48 : f32 to vector<1x256xf32>
    %127 = arith.subf %126, %125 : vector<1x256xf32>
    %128 = vector.broadcast %127 : vector<1x256xf32> to vector<8x256xf32>
    %129 = arith.mulf %9, %128 : vector<8x256xf32>
    %c255_i32 = arith.constant 255 : i32
    %130 = tpu.dynamic_rotate %9 by %c255_i32 dim 1 : vector<8x256xf32>, i32 -> vector<8x256xf32>
    %131 = vector.broadcast %4 : vector<1x256xf32> to vector<8x256xf32>
    %132 = arith.mulf %130, %131 : vector<8x256xf32>
    %c255_i32_49 = arith.constant 255 : i32
    %133 = tpu.dynamic_rotate %18 by %c255_i32_49 dim 1 : vector<1x256xf32>, i32 -> vector<1x256xf32>
    %cst_50 = arith.constant 0.000000e+00 : f32
    %cst_51 = arith.constant 1.000000e+00 : f32
    %134 = vector.broadcast %cst_50 : f32 to vector<1x256xf32>
    %135 = arith.maximumf %134, %133 : vector<1x256xf32>
    %136 = vector.broadcast %cst_51 : f32 to vector<1x256xf32>
    %137 = arith.minimumf %136, %135 : vector<1x256xf32>
    %138 = vector.broadcast %137 : vector<1x256xf32> to vector<8x256xf32>
    %139 = arith.mulf %132, %138 : vector<8x256xf32>
    %cst_52 = arith.constant 0.000000e+00 : f32
    %140 = vector.broadcast %cst_52 : f32 to vector<1x256xf32>
    %141 = arith.subf %140, %133 : vector<1x256xf32>
    %cst_53 = arith.constant 0.000000e+00 : f32
    %cst_54 = arith.constant 1.000000e+00 : f32
    %142 = vector.broadcast %cst_53 : f32 to vector<1x256xf32>
    %143 = arith.maximumf %142, %141 : vector<1x256xf32>
    %144 = vector.broadcast %cst_54 : f32 to vector<1x256xf32>
    %145 = arith.minimumf %144, %143 : vector<1x256xf32>
    %146 = vector.broadcast %145 : vector<1x256xf32> to vector<8x256xf32>
    %147 = arith.mulf %132, %146 : vector<8x256xf32>
    %148 = math.absf %133 : vector<1x256xf32>
    %cst_55 = arith.constant 5.000000e-01 : f32
    %149 = vector.broadcast %cst_55 : f32 to vector<1x256xf32>
    %150 = arith.subf %149, %148 : vector<1x256xf32>
    %151 = vector.broadcast %150 : vector<1x256xf32> to vector<8x256xf32>
    %152 = arith.mulf %132, %151 : vector<8x256xf32>
    %c241_i32 = arith.constant 241 : i32
    %153 = tpu.dynamic_rotate %9 by %c241_i32 dim 1 : vector<8x256xf32>, i32 -> vector<8x256xf32>
    %154 = vector.broadcast %5 : vector<1x256xf32> to vector<8x256xf32>
    %155 = arith.mulf %153, %154 : vector<8x256xf32>
    %c241_i32_56 = arith.constant 241 : i32
    %156 = tpu.dynamic_rotate %18 by %c241_i32_56 dim 1 : vector<1x256xf32>, i32 -> vector<1x256xf32>
    %cst_57 = arith.constant 0.000000e+00 : f32
    %cst_58 = arith.constant 1.000000e+00 : f32
    %157 = vector.broadcast %cst_57 : f32 to vector<1x256xf32>
    %158 = arith.maximumf %157, %156 : vector<1x256xf32>
    %159 = vector.broadcast %cst_58 : f32 to vector<1x256xf32>
    %160 = arith.minimumf %159, %158 : vector<1x256xf32>
    %161 = vector.broadcast %160 : vector<1x256xf32> to vector<8x256xf32>
    %162 = arith.mulf %155, %161 : vector<8x256xf32>
    %cst_59 = arith.constant 0.000000e+00 : f32
    %163 = vector.broadcast %cst_59 : f32 to vector<1x256xf32>
    %164 = arith.subf %163, %156 : vector<1x256xf32>
    %cst_60 = arith.constant 0.000000e+00 : f32
    %cst_61 = arith.constant 1.000000e+00 : f32
    %165 = vector.broadcast %cst_60 : f32 to vector<1x256xf32>
    %166 = arith.maximumf %165, %164 : vector<1x256xf32>
    %167 = vector.broadcast %cst_61 : f32 to vector<1x256xf32>
    %168 = arith.minimumf %167, %166 : vector<1x256xf32>
    %169 = vector.broadcast %168 : vector<1x256xf32> to vector<8x256xf32>
    %170 = arith.mulf %155, %169 : vector<8x256xf32>
    %171 = math.absf %156 : vector<1x256xf32>
    %cst_62 = arith.constant 5.000000e-01 : f32
    %172 = vector.broadcast %cst_62 : f32 to vector<1x256xf32>
    %173 = arith.subf %172, %171 : vector<1x256xf32>
    %174 = vector.broadcast %173 : vector<1x256xf32> to vector<8x256xf32>
    %175 = arith.mulf %155, %174 : vector<8x256xf32>
    %c240_i32 = arith.constant 240 : i32
    %176 = tpu.dynamic_rotate %9 by %c240_i32 dim 1 : vector<8x256xf32>, i32 -> vector<8x256xf32>
    %177 = vector.broadcast %6 : vector<1x256xf32> to vector<8x256xf32>
    %178 = arith.mulf %176, %177 : vector<8x256xf32>
    %c240_i32_63 = arith.constant 240 : i32
    %179 = tpu.dynamic_rotate %18 by %c240_i32_63 dim 1 : vector<1x256xf32>, i32 -> vector<1x256xf32>
    %cst_64 = arith.constant 0.000000e+00 : f32
    %cst_65 = arith.constant 1.000000e+00 : f32
    %180 = vector.broadcast %cst_64 : f32 to vector<1x256xf32>
    %181 = arith.maximumf %180, %179 : vector<1x256xf32>
    %182 = vector.broadcast %cst_65 : f32 to vector<1x256xf32>
    %183 = arith.minimumf %182, %181 : vector<1x256xf32>
    %184 = vector.broadcast %183 : vector<1x256xf32> to vector<8x256xf32>
    %185 = arith.mulf %178, %184 : vector<8x256xf32>
    %cst_66 = arith.constant 0.000000e+00 : f32
    %186 = vector.broadcast %cst_66 : f32 to vector<1x256xf32>
    %187 = arith.subf %186, %179 : vector<1x256xf32>
    %cst_67 = arith.constant 0.000000e+00 : f32
    %cst_68 = arith.constant 1.000000e+00 : f32
    %188 = vector.broadcast %cst_67 : f32 to vector<1x256xf32>
    %189 = arith.maximumf %188, %187 : vector<1x256xf32>
    %190 = vector.broadcast %cst_68 : f32 to vector<1x256xf32>
    %191 = arith.minimumf %190, %189 : vector<1x256xf32>
    %192 = vector.broadcast %191 : vector<1x256xf32> to vector<8x256xf32>
    %193 = arith.mulf %178, %192 : vector<8x256xf32>
    %194 = math.absf %179 : vector<1x256xf32>
    %cst_69 = arith.constant 5.000000e-01 : f32
    %195 = vector.broadcast %cst_69 : f32 to vector<1x256xf32>
    %196 = arith.subf %195, %194 : vector<1x256xf32>
    %197 = vector.broadcast %196 : vector<1x256xf32> to vector<8x256xf32>
    %198 = arith.mulf %178, %197 : vector<8x256xf32>
    %c239_i32 = arith.constant 239 : i32
    %199 = tpu.dynamic_rotate %9 by %c239_i32 dim 1 : vector<8x256xf32>, i32 -> vector<8x256xf32>
    %200 = vector.broadcast %7 : vector<1x256xf32> to vector<8x256xf32>
    %201 = arith.mulf %199, %200 : vector<8x256xf32>
    %c239_i32_70 = arith.constant 239 : i32
    %202 = tpu.dynamic_rotate %18 by %c239_i32_70 dim 1 : vector<1x256xf32>, i32 -> vector<1x256xf32>
    %cst_71 = arith.constant 0.000000e+00 : f32
    %cst_72 = arith.constant 1.000000e+00 : f32
    %203 = vector.broadcast %cst_71 : f32 to vector<1x256xf32>
    %204 = arith.maximumf %203, %202 : vector<1x256xf32>
    %205 = vector.broadcast %cst_72 : f32 to vector<1x256xf32>
    %206 = arith.minimumf %205, %204 : vector<1x256xf32>
    %207 = vector.broadcast %206 : vector<1x256xf32> to vector<8x256xf32>
    %208 = arith.mulf %201, %207 : vector<8x256xf32>
    %cst_73 = arith.constant 0.000000e+00 : f32
    %209 = vector.broadcast %cst_73 : f32 to vector<1x256xf32>
    %210 = arith.subf %209, %202 : vector<1x256xf32>
    %cst_74 = arith.constant 0.000000e+00 : f32
    %cst_75 = arith.constant 1.000000e+00 : f32
    %211 = vector.broadcast %cst_74 : f32 to vector<1x256xf32>
    %212 = arith.maximumf %211, %210 : vector<1x256xf32>
    %213 = vector.broadcast %cst_75 : f32 to vector<1x256xf32>
    %214 = arith.minimumf %213, %212 : vector<1x256xf32>
    %215 = vector.broadcast %214 : vector<1x256xf32> to vector<8x256xf32>
    %216 = arith.mulf %201, %215 : vector<8x256xf32>
    %217 = math.absf %202 : vector<1x256xf32>
    %cst_76 = arith.constant 5.000000e-01 : f32
    %218 = vector.broadcast %cst_76 : f32 to vector<1x256xf32>
    %219 = arith.subf %218, %217 : vector<1x256xf32>
    %220 = vector.broadcast %219 : vector<1x256xf32> to vector<8x256xf32>
    %221 = arith.mulf %201, %220 : vector<8x256xf32>
    %222 = tpu.concatenate %28, %51, %74, %97, %116, %139, %162, %185, %208 in 0 : vector<8x256xf32>, vector<8x256xf32>, vector<8x256xf32>, vector<8x256xf32>, vector<8x256xf32>, vector<8x256xf32>, vector<8x256xf32>, vector<8x256xf32>, vector<8x256xf32> -> vector<72x256xf32>
    %c0_77 = arith.constant 0 : index
    %c0_78 = arith.constant 0 : index
    %c0_79 = arith.constant 0 : index
    %223 = vector.load %arg4[%c0_77, %c0_78, %c0_79] : memref<3x8x72xf32, #tpu.memory_space<vmem>>, vector<1x8x72xf32>
    %224 = vector.shape_cast %223 : vector<1x8x72xf32> to vector<8x72xf32>
    %cst_80 = arith.constant dense<0.000000e+00> : vector<8x256xf32>
    %225 = tpu.matmul %224, %222, %cst_80 {dimension_numbers = #tpu.dot_dimension_numbers<[1], [0], [0], [1], [0, 0, 1, 1], [], []>} : vector<8x72xf32>, vector<72x256xf32>, vector<8x256xf32> -> vector<8x256xf32>
    %c0_81 = arith.constant 0 : index
    %c0_82 = arith.constant 0 : index
    %c0_83 = arith.constant 0 : index
    %226 = vector.load %arg5[%c0_81, %c0_82, %c0_83] : memref<3x8x1xf32, #tpu.memory_space<vmem>>, vector<1x8x1xf32>
    %227 = vector.shape_cast %226 : vector<1x8x1xf32> to vector<8x1xf32>
    %228 = vector.broadcast %227 : vector<8x1xf32> to vector<8x256xf32>
    %229 = arith.addf %225, %228 : vector<8x256xf32>
    %cst_84 = arith.constant 0.000000e+00 : f32
    %230 = vector.broadcast %cst_84 : f32 to vector<8x256xf32>
    %231 = arith.maximumf %229, %230 : vector<8x256xf32>
    %232 = tpu.concatenate %36, %59, %82, %105, %124, %147, %170, %193, %216 in 0 : vector<8x256xf32>, vector<8x256xf32>, vector<8x256xf32>, vector<8x256xf32>, vector<8x256xf32>, vector<8x256xf32>, vector<8x256xf32>, vector<8x256xf32>, vector<8x256xf32> -> vector<72x256xf32>
    %c1_85 = arith.constant 1 : index
    %c0_86 = arith.constant 0 : index
    %c0_87 = arith.constant 0 : index
    %233 = vector.load %arg4[%c1_85, %c0_86, %c0_87] : memref<3x8x72xf32, #tpu.memory_space<vmem>>, vector<1x8x72xf32>
    %234 = vector.shape_cast %233 : vector<1x8x72xf32> to vector<8x72xf32>
    %cst_88 = arith.constant dense<0.000000e+00> : vector<8x256xf32>
    %235 = tpu.matmul %234, %232, %cst_88 {dimension_numbers = #tpu.dot_dimension_numbers<[1], [0], [0], [1], [0, 0, 1, 1], [], []>} : vector<8x72xf32>, vector<72x256xf32>, vector<8x256xf32> -> vector<8x256xf32>
    %c1_89 = arith.constant 1 : index
    %c0_90 = arith.constant 0 : index
    %c0_91 = arith.constant 0 : index
    %236 = vector.load %arg5[%c1_89, %c0_90, %c0_91] : memref<3x8x1xf32, #tpu.memory_space<vmem>>, vector<1x8x1xf32>
    %237 = vector.shape_cast %236 : vector<1x8x1xf32> to vector<8x1xf32>
    %238 = vector.broadcast %237 : vector<8x1xf32> to vector<8x256xf32>
    %239 = arith.addf %235, %238 : vector<8x256xf32>
    %cst_92 = arith.constant 0.000000e+00 : f32
    %240 = vector.broadcast %cst_92 : f32 to vector<8x256xf32>
    %241 = arith.maximumf %239, %240 : vector<8x256xf32>
    %242 = tpu.concatenate %41, %64, %87, %110, %129, %152, %175, %198, %221 in 0 : vector<8x256xf32>, vector<8x256xf32>, vector<8x256xf32>, vector<8x256xf32>, vector<8x256xf32>, vector<8x256xf32>, vector<8x256xf32>, vector<8x256xf32>, vector<8x256xf32> -> vector<72x256xf32>
    %c2_93 = arith.constant 2 : index
    %c0_94 = arith.constant 0 : index
    %c0_95 = arith.constant 0 : index
    %243 = vector.load %arg4[%c2_93, %c0_94, %c0_95] : memref<3x8x72xf32, #tpu.memory_space<vmem>>, vector<1x8x72xf32>
    %244 = vector.shape_cast %243 : vector<1x8x72xf32> to vector<8x72xf32>
    %cst_96 = arith.constant dense<0.000000e+00> : vector<8x256xf32>
    %245 = tpu.matmul %244, %242, %cst_96 {dimension_numbers = #tpu.dot_dimension_numbers<[1], [0], [0], [1], [0, 0, 1, 1], [], []>} : vector<8x72xf32>, vector<72x256xf32>, vector<8x256xf32> -> vector<8x256xf32>
    %c2_97 = arith.constant 2 : index
    %c0_98 = arith.constant 0 : index
    %c0_99 = arith.constant 0 : index
    %246 = vector.load %arg5[%c2_97, %c0_98, %c0_99] : memref<3x8x1xf32, #tpu.memory_space<vmem>>, vector<1x8x1xf32>
    %247 = vector.shape_cast %246 : vector<1x8x1xf32> to vector<8x1xf32>
    %248 = vector.broadcast %247 : vector<8x1xf32> to vector<8x256xf32>
    %249 = arith.addf %245, %248 : vector<8x256xf32>
    %cst_100 = arith.constant 0.000000e+00 : f32
    %250 = vector.broadcast %cst_100 : f32 to vector<8x256xf32>
    %251 = arith.maximumf %249, %250 : vector<8x256xf32>
    %252 = tpu.concatenate %231, %241, %251 in 0 : vector<8x256xf32>, vector<8x256xf32>, vector<8x256xf32> -> vector<24x256xf32>
    %c0_101 = arith.constant 0 : index
    %c0_102 = arith.constant 0 : index
    %253 = vector.load %arg6[%c0_101, %c0_102] : memref<8x24xf32, #tpu.memory_space<vmem>>, vector<8x24xf32>
    %cst_103 = arith.constant dense<0.000000e+00> : vector<8x256xf32>
    %254 = tpu.matmul %253, %252, %cst_103 {dimension_numbers = #tpu.dot_dimension_numbers<[1], [0], [0], [1], [0, 0, 1, 1], [], []>} : vector<8x24xf32>, vector<24x256xf32>, vector<8x256xf32> -> vector<8x256xf32>
    %c0_104 = arith.constant 0 : index
    %c0_105 = arith.constant 0 : index
    %255 = vector.load %arg7[%c0_104, %c0_105] : memref<8x1xf32, #tpu.memory_space<vmem>>, vector<8x1xf32>
    %256 = vector.broadcast %255 : vector<8x1xf32> to vector<8x256xf32>
    %257 = arith.addf %254, %256 : vector<8x256xf32>
    %c0_106 = arith.constant 0 : index
    %c0_107 = arith.constant 0 : index
    %c0_108 = arith.constant 0 : index
    %258 = vector.load %arg8[%c0_106, %c0_107, %c0_108] : memref<3x8x72xf32, #tpu.memory_space<vmem>>, vector<1x8x72xf32>
    %259 = vector.shape_cast %258 : vector<1x8x72xf32> to vector<8x72xf32>
    %c0_109 = arith.constant 0 : index
    %c0_110 = arith.constant 0 : index
    %c0_111 = arith.constant 0 : index
    %260 = vector.load %arg9[%c0_109, %c0_110, %c0_111] : memref<3x8x1xf32, #tpu.memory_space<vmem>>, vector<1x8x1xf32>
    %261 = vector.shape_cast %260 : vector<1x8x1xf32> to vector<8x1xf32>
    %c17_i32_112 = arith.constant 17 : i32
    %262 = tpu.dynamic_rotate %257 by %c17_i32_112 dim 1 : vector<8x256xf32>, i32 -> vector<8x256xf32>
    %263 = vector.broadcast %0 : vector<1x256xf32> to vector<8x256xf32>
    %264 = arith.mulf %262, %263 : vector<8x256xf32>
    %c16_i32_113 = arith.constant 16 : i32
    %265 = tpu.dynamic_rotate %257 by %c16_i32_113 dim 1 : vector<8x256xf32>, i32 -> vector<8x256xf32>
    %266 = vector.broadcast %1 : vector<1x256xf32> to vector<8x256xf32>
    %267 = arith.mulf %265, %266 : vector<8x256xf32>
    %c15_i32_114 = arith.constant 15 : i32
    %268 = tpu.dynamic_rotate %257 by %c15_i32_114 dim 1 : vector<8x256xf32>, i32 -> vector<8x256xf32>
    %269 = vector.broadcast %2 : vector<1x256xf32> to vector<8x256xf32>
    %270 = arith.mulf %268, %269 : vector<8x256xf32>
    %c1_i32_115 = arith.constant 1 : i32
    %271 = tpu.dynamic_rotate %257 by %c1_i32_115 dim 1 : vector<8x256xf32>, i32 -> vector<8x256xf32>
    %272 = vector.broadcast %3 : vector<1x256xf32> to vector<8x256xf32>
    %273 = arith.mulf %271, %272 : vector<8x256xf32>
    %c255_i32_116 = arith.constant 255 : i32
    %274 = tpu.dynamic_rotate %257 by %c255_i32_116 dim 1 : vector<8x256xf32>, i32 -> vector<8x256xf32>
    %275 = vector.broadcast %4 : vector<1x256xf32> to vector<8x256xf32>
    %276 = arith.mulf %274, %275 : vector<8x256xf32>
    %c241_i32_117 = arith.constant 241 : i32
    %277 = tpu.dynamic_rotate %257 by %c241_i32_117 dim 1 : vector<8x256xf32>, i32 -> vector<8x256xf32>
    %278 = vector.broadcast %5 : vector<1x256xf32> to vector<8x256xf32>
    %279 = arith.mulf %277, %278 : vector<8x256xf32>
    %c240_i32_118 = arith.constant 240 : i32
    %280 = tpu.dynamic_rotate %257 by %c240_i32_118 dim 1 : vector<8x256xf32>, i32 -> vector<8x256xf32>
    %281 = vector.broadcast %6 : vector<1x256xf32> to vector<8x256xf32>
    %282 = arith.mulf %280, %281 : vector<8x256xf32>
    %c239_i32_119 = arith.constant 239 : i32
    %283 = tpu.dynamic_rotate %257 by %c239_i32_119 dim 1 : vector<8x256xf32>, i32 -> vector<8x256xf32>
    %284 = vector.broadcast %7 : vector<1x256xf32> to vector<8x256xf32>
    %285 = arith.mulf %283, %284 : vector<8x256xf32>
    %286 = tpu.concatenate %264, %267, %270, %273, %257, %276, %279, %282, %285 in 0 : vector<8x256xf32>, vector<8x256xf32>, vector<8x256xf32>, vector<8x256xf32>, vector<8x256xf32>, vector<8x256xf32>, vector<8x256xf32>, vector<8x256xf32>, vector<8x256xf32> -> vector<72x256xf32>
    %cst_120 = arith.constant dense<0.000000e+00> : vector<8x256xf32>
    %287 = tpu.matmul %259, %286, %cst_120 {dimension_numbers = #tpu.dot_dimension_numbers<[1], [0], [0], [1], [0, 0, 1, 1], [], []>} : vector<8x72xf32>, vector<72x256xf32>, vector<8x256xf32> -> vector<8x256xf32>
    %288 = vector.broadcast %261 : vector<8x1xf32> to vector<8x256xf32>
    %289 = arith.addf %287, %288 : vector<8x256xf32>
    %cst_121 = arith.constant 0.000000e+00 : f32
    %290 = vector.broadcast %cst_121 : f32 to vector<8x256xf32>
    %291 = arith.maximumf %289, %290 : vector<8x256xf32>
    %c1_122 = arith.constant 1 : index
    %c0_123 = arith.constant 0 : index
    %c0_124 = arith.constant 0 : index
    %292 = vector.load %arg8[%c1_122, %c0_123, %c0_124] : memref<3x8x72xf32, #tpu.memory_space<vmem>>, vector<1x8x72xf32>
    %293 = vector.shape_cast %292 : vector<1x8x72xf32> to vector<8x72xf32>
    %c1_125 = arith.constant 1 : index
    %c0_126 = arith.constant 0 : index
    %c0_127 = arith.constant 0 : index
    %294 = vector.load %arg9[%c1_125, %c0_126, %c0_127] : memref<3x8x1xf32, #tpu.memory_space<vmem>>, vector<1x8x1xf32>
    %295 = vector.shape_cast %294 : vector<1x8x1xf32> to vector<8x1xf32>
    %c17_i32_128 = arith.constant 17 : i32
    %296 = tpu.dynamic_rotate %291 by %c17_i32_128 dim 1 : vector<8x256xf32>, i32 -> vector<8x256xf32>
    %297 = vector.broadcast %0 : vector<1x256xf32> to vector<8x256xf32>
    %298 = arith.mulf %296, %297 : vector<8x256xf32>
    %c16_i32_129 = arith.constant 16 : i32
    %299 = tpu.dynamic_rotate %291 by %c16_i32_129 dim 1 : vector<8x256xf32>, i32 -> vector<8x256xf32>
    %300 = vector.broadcast %1 : vector<1x256xf32> to vector<8x256xf32>
    %301 = arith.mulf %299, %300 : vector<8x256xf32>
    %c15_i32_130 = arith.constant 15 : i32
    %302 = tpu.dynamic_rotate %291 by %c15_i32_130 dim 1 : vector<8x256xf32>, i32 -> vector<8x256xf32>
    %303 = vector.broadcast %2 : vector<1x256xf32> to vector<8x256xf32>
    %304 = arith.mulf %302, %303 : vector<8x256xf32>
    %c1_i32_131 = arith.constant 1 : i32
    %305 = tpu.dynamic_rotate %291 by %c1_i32_131 dim 1 : vector<8x256xf32>, i32 -> vector<8x256xf32>
    %306 = vector.broadcast %3 : vector<1x256xf32> to vector<8x256xf32>
    %307 = arith.mulf %305, %306 : vector<8x256xf32>
    %c255_i32_132 = arith.constant 255 : i32
    %308 = tpu.dynamic_rotate %291 by %c255_i32_132 dim 1 : vector<8x256xf32>, i32 -> vector<8x256xf32>
    %309 = vector.broadcast %4 : vector<1x256xf32> to vector<8x256xf32>
    %310 = arith.mulf %308, %309 : vector<8x256xf32>
    %c241_i32_133 = arith.constant 241 : i32
    %311 = tpu.dynamic_rotate %291 by %c241_i32_133 dim 1 : vector<8x256xf32>, i32 -> vector<8x256xf32>
    %312 = vector.broadcast %5 : vector<1x256xf32> to vector<8x256xf32>
    %313 = arith.mulf %311, %312 : vector<8x256xf32>
    %c240_i32_134 = arith.constant 240 : i32
    %314 = tpu.dynamic_rotate %291 by %c240_i32_134 dim 1 : vector<8x256xf32>, i32 -> vector<8x256xf32>
    %315 = vector.broadcast %6 : vector<1x256xf32> to vector<8x256xf32>
    %316 = arith.mulf %314, %315 : vector<8x256xf32>
    %c239_i32_135 = arith.constant 239 : i32
    %317 = tpu.dynamic_rotate %291 by %c239_i32_135 dim 1 : vector<8x256xf32>, i32 -> vector<8x256xf32>
    %318 = vector.broadcast %7 : vector<1x256xf32> to vector<8x256xf32>
    %319 = arith.mulf %317, %318 : vector<8x256xf32>
    %320 = tpu.concatenate %298, %301, %304, %307, %291, %310, %313, %316, %319 in 0 : vector<8x256xf32>, vector<8x256xf32>, vector<8x256xf32>, vector<8x256xf32>, vector<8x256xf32>, vector<8x256xf32>, vector<8x256xf32>, vector<8x256xf32>, vector<8x256xf32> -> vector<72x256xf32>
    %cst_136 = arith.constant dense<0.000000e+00> : vector<8x256xf32>
    %321 = tpu.matmul %293, %320, %cst_136 {dimension_numbers = #tpu.dot_dimension_numbers<[1], [0], [0], [1], [0, 0, 1, 1], [], []>} : vector<8x72xf32>, vector<72x256xf32>, vector<8x256xf32> -> vector<8x256xf32>
    %322 = vector.broadcast %295 : vector<8x1xf32> to vector<8x256xf32>
    %323 = arith.addf %321, %322 : vector<8x256xf32>
    %cst_137 = arith.constant 0.000000e+00 : f32
    %324 = vector.broadcast %cst_137 : f32 to vector<8x256xf32>
    %325 = arith.maximumf %323, %324 : vector<8x256xf32>
    %c2_138 = arith.constant 2 : index
    %c0_139 = arith.constant 0 : index
    %c0_140 = arith.constant 0 : index
    %326 = vector.load %arg8[%c2_138, %c0_139, %c0_140] : memref<3x8x72xf32, #tpu.memory_space<vmem>>, vector<1x8x72xf32>
    %327 = vector.shape_cast %326 : vector<1x8x72xf32> to vector<8x72xf32>
    %c2_141 = arith.constant 2 : index
    %c0_142 = arith.constant 0 : index
    %c0_143 = arith.constant 0 : index
    %328 = vector.load %arg9[%c2_141, %c0_142, %c0_143] : memref<3x8x1xf32, #tpu.memory_space<vmem>>, vector<1x8x1xf32>
    %329 = vector.shape_cast %328 : vector<1x8x1xf32> to vector<8x1xf32>
    %c17_i32_144 = arith.constant 17 : i32
    %330 = tpu.dynamic_rotate %325 by %c17_i32_144 dim 1 : vector<8x256xf32>, i32 -> vector<8x256xf32>
    %331 = vector.broadcast %0 : vector<1x256xf32> to vector<8x256xf32>
    %332 = arith.mulf %330, %331 : vector<8x256xf32>
    %c16_i32_145 = arith.constant 16 : i32
    %333 = tpu.dynamic_rotate %325 by %c16_i32_145 dim 1 : vector<8x256xf32>, i32 -> vector<8x256xf32>
    %334 = vector.broadcast %1 : vector<1x256xf32> to vector<8x256xf32>
    %335 = arith.mulf %333, %334 : vector<8x256xf32>
    %c15_i32_146 = arith.constant 15 : i32
    %336 = tpu.dynamic_rotate %325 by %c15_i32_146 dim 1 : vector<8x256xf32>, i32 -> vector<8x256xf32>
    %337 = vector.broadcast %2 : vector<1x256xf32> to vector<8x256xf32>
    %338 = arith.mulf %336, %337 : vector<8x256xf32>
    %c1_i32_147 = arith.constant 1 : i32
    %339 = tpu.dynamic_rotate %325 by %c1_i32_147 dim 1 : vector<8x256xf32>, i32 -> vector<8x256xf32>
    %340 = vector.broadcast %3 : vector<1x256xf32> to vector<8x256xf32>
    %341 = arith.mulf %339, %340 : vector<8x256xf32>
    %c255_i32_148 = arith.constant 255 : i32
    %342 = tpu.dynamic_rotate %325 by %c255_i32_148 dim 1 : vector<8x256xf32>, i32 -> vector<8x256xf32>
    %343 = vector.broadcast %4 : vector<1x256xf32> to vector<8x256xf32>
    %344 = arith.mulf %342, %343 : vector<8x256xf32>
    %c241_i32_149 = arith.constant 241 : i32
    %345 = tpu.dynamic_rotate %325 by %c241_i32_149 dim 1 : vector<8x256xf32>, i32 -> vector<8x256xf32>
    %346 = vector.broadcast %5 : vector<1x256xf32> to vector<8x256xf32>
    %347 = arith.mulf %345, %346 : vector<8x256xf32>
    %c240_i32_150 = arith.constant 240 : i32
    %348 = tpu.dynamic_rotate %325 by %c240_i32_150 dim 1 : vector<8x256xf32>, i32 -> vector<8x256xf32>
    %349 = vector.broadcast %6 : vector<1x256xf32> to vector<8x256xf32>
    %350 = arith.mulf %348, %349 : vector<8x256xf32>
    %c239_i32_151 = arith.constant 239 : i32
    %351 = tpu.dynamic_rotate %325 by %c239_i32_151 dim 1 : vector<8x256xf32>, i32 -> vector<8x256xf32>
    %352 = vector.broadcast %7 : vector<1x256xf32> to vector<8x256xf32>
    %353 = arith.mulf %351, %352 : vector<8x256xf32>
    %354 = tpu.concatenate %332, %335, %338, %341, %325, %344, %347, %350, %353 in 0 : vector<8x256xf32>, vector<8x256xf32>, vector<8x256xf32>, vector<8x256xf32>, vector<8x256xf32>, vector<8x256xf32>, vector<8x256xf32>, vector<8x256xf32>, vector<8x256xf32> -> vector<72x256xf32>
    %cst_152 = arith.constant dense<0.000000e+00> : vector<8x256xf32>
    %355 = tpu.matmul %327, %354, %cst_152 {dimension_numbers = #tpu.dot_dimension_numbers<[1], [0], [0], [1], [0, 0, 1, 1], [], []>} : vector<8x72xf32>, vector<72x256xf32>, vector<8x256xf32> -> vector<8x256xf32>
    %356 = vector.broadcast %329 : vector<8x1xf32> to vector<8x256xf32>
    %357 = arith.addf %355, %356 : vector<8x256xf32>
    %cst_153 = arith.constant 0.000000e+00 : f32
    %358 = vector.broadcast %cst_153 : f32 to vector<8x256xf32>
    %359 = arith.maximumf %357, %358 : vector<8x256xf32>
    %c0_154 = arith.constant 0 : index
    %c0_155 = arith.constant 0 : index
    %360 = vector.load %arg10[%c0_154, %c0_155] : memref<1x72xf32, #tpu.memory_space<vmem>>, vector<1x72xf32>
    %c0_156 = arith.constant 0 : index
    %c0_157 = arith.constant 0 : index
    %361 = vector.load %arg11[%c0_156, %c0_157] : memref<1x1xf32, #tpu.memory_space<vmem>>, vector<1x1xf32>
    %c17_i32_158 = arith.constant 17 : i32
    %362 = tpu.dynamic_rotate %359 by %c17_i32_158 dim 1 : vector<8x256xf32>, i32 -> vector<8x256xf32>
    %363 = vector.broadcast %0 : vector<1x256xf32> to vector<8x256xf32>
    %364 = arith.mulf %362, %363 : vector<8x256xf32>
    %c16_i32_159 = arith.constant 16 : i32
    %365 = tpu.dynamic_rotate %359 by %c16_i32_159 dim 1 : vector<8x256xf32>, i32 -> vector<8x256xf32>
    %366 = vector.broadcast %1 : vector<1x256xf32> to vector<8x256xf32>
    %367 = arith.mulf %365, %366 : vector<8x256xf32>
    %c15_i32_160 = arith.constant 15 : i32
    %368 = tpu.dynamic_rotate %359 by %c15_i32_160 dim 1 : vector<8x256xf32>, i32 -> vector<8x256xf32>
    %369 = vector.broadcast %2 : vector<1x256xf32> to vector<8x256xf32>
    %370 = arith.mulf %368, %369 : vector<8x256xf32>
    %c1_i32_161 = arith.constant 1 : i32
    %371 = tpu.dynamic_rotate %359 by %c1_i32_161 dim 1 : vector<8x256xf32>, i32 -> vector<8x256xf32>
    %372 = vector.broadcast %3 : vector<1x256xf32> to vector<8x256xf32>
    %373 = arith.mulf %371, %372 : vector<8x256xf32>
    %c255_i32_162 = arith.constant 255 : i32
    %374 = tpu.dynamic_rotate %359 by %c255_i32_162 dim 1 : vector<8x256xf32>, i32 -> vector<8x256xf32>
    %375 = vector.broadcast %4 : vector<1x256xf32> to vector<8x256xf32>
    %376 = arith.mulf %374, %375 : vector<8x256xf32>
    %c241_i32_163 = arith.constant 241 : i32
    %377 = tpu.dynamic_rotate %359 by %c241_i32_163 dim 1 : vector<8x256xf32>, i32 -> vector<8x256xf32>
    %378 = vector.broadcast %5 : vector<1x256xf32> to vector<8x256xf32>
    %379 = arith.mulf %377, %378 : vector<8x256xf32>
    %c240_i32_164 = arith.constant 240 : i32
    %380 = tpu.dynamic_rotate %359 by %c240_i32_164 dim 1 : vector<8x256xf32>, i32 -> vector<8x256xf32>
    %381 = vector.broadcast %6 : vector<1x256xf32> to vector<8x256xf32>
    %382 = arith.mulf %380, %381 : vector<8x256xf32>
    %c239_i32_165 = arith.constant 239 : i32
    %383 = tpu.dynamic_rotate %359 by %c239_i32_165 dim 1 : vector<8x256xf32>, i32 -> vector<8x256xf32>
    %384 = vector.broadcast %7 : vector<1x256xf32> to vector<8x256xf32>
    %385 = arith.mulf %383, %384 : vector<8x256xf32>
    %386 = tpu.concatenate %364, %367, %370, %373, %359, %376, %379, %382, %385 in 0 : vector<8x256xf32>, vector<8x256xf32>, vector<8x256xf32>, vector<8x256xf32>, vector<8x256xf32>, vector<8x256xf32>, vector<8x256xf32>, vector<8x256xf32>, vector<8x256xf32> -> vector<72x256xf32>
    %cst_166 = arith.constant dense<0.000000e+00> : vector<1x256xf32>
    %387 = tpu.matmul %360, %386, %cst_166 {dimension_numbers = #tpu.dot_dimension_numbers<[1], [0], [0], [1], [0, 0, 1, 1], [], []>} : vector<1x72xf32>, vector<72x256xf32>, vector<1x256xf32> -> vector<1x256xf32>
    %388 = vector.broadcast %361 : vector<1x1xf32> to vector<1x256xf32>
    %389 = arith.addf %387, %388 : vector<1x256xf32>
    %390 = arith.addf %389, %11 : vector<1x256xf32>
    %391 = vector.shape_cast %390 : vector<1x256xf32> to vector<1x1x256xf32>
    %c0_167 = arith.constant 0 : index
    %c0_168 = arith.constant 0 : index
    %c0_169 = arith.constant 0 : index
    %392 = vector.load %arg12[%c0_167, %c0_168, %c0_169] : memref<1x1x256xf32, #tpu.memory_space<vmem>>, vector<1x1x256xf32>
    tpu.vector_store %arg12[%c0_167, %c0_168, %c0_169], %391 {strides = array<i32>} : memref<1x1x256xf32, #tpu.memory_space<vmem>>, vector<1x1x256xf32>,
    return
  }
  func.func @transform_0(%arg0: i32) -> (i32, i32, i32) {
    %c0_i32 = arith.constant 0 : i32
    %c0_i32_0 = arith.constant 0 : i32
    %c0_i32_1 = arith.constant 0 : i32
    return %arg0, %c0_i32, %c0_i32_0 : i32, i32, i32
  }
  func.func @transform_1(%arg0: i32) -> (i32, i32, i32) {
    %c0_i32 = arith.constant 0 : i32
    %c0_i32_0 = arith.constant 0 : i32
    %c0_i32_1 = arith.constant 0 : i32
    return %arg0, %c0_i32, %c0_i32_0 : i32, i32, i32
  }
  func.func @transform_2(%arg0: i32) -> (i32, i32) {
    %c0_i32 = arith.constant 0 : i32
    %c0_i32_0 = arith.constant 0 : i32
    %c0_i32_1 = arith.constant 0 : i32
    return %c0_i32, %c0_i32_0 : i32, i32
  }
  func.func @transform_3(%arg0: i32) -> (i32, i32, i32) {
    %c0_i32 = arith.constant 0 : i32
    %c0_i32_0 = arith.constant 0 : i32
    %c0_i32_1 = arith.constant 0 : i32
    %c0_i32_2 = arith.constant 0 : i32
    return %c0_i32, %c0_i32_0, %c0_i32_1 : i32, i32, i32
  }
  func.func @transform_4(%arg0: i32) -> (i32, i32, i32) {
    %c0_i32 = arith.constant 0 : i32
    %c0_i32_0 = arith.constant 0 : i32
    %c0_i32_1 = arith.constant 0 : i32
    %c0_i32_2 = arith.constant 0 : i32
    return %c0_i32, %c0_i32_0, %c0_i32_1 : i32, i32, i32
  }
  func.func @transform_5(%arg0: i32) -> (i32, i32) {
    %c0_i32 = arith.constant 0 : i32
    %c0_i32_0 = arith.constant 0 : i32
    %c0_i32_1 = arith.constant 0 : i32
    return %c0_i32, %c0_i32_0 : i32, i32
  }
  func.func @transform_6(%arg0: i32) -> (i32, i32) {
    %c0_i32 = arith.constant 0 : i32
    %c0_i32_0 = arith.constant 0 : i32
    %c0_i32_1 = arith.constant 0 : i32
    return %c0_i32, %c0_i32_0 : i32, i32
  }
  func.func @transform_7(%arg0: i32) -> (i32, i32, i32) {
    %c0_i32 = arith.constant 0 : i32
    %c0_i32_0 = arith.constant 0 : i32
    %c0_i32_1 = arith.constant 0 : i32
    %c0_i32_2 = arith.constant 0 : i32
    return %c0_i32, %c0_i32_0, %c0_i32_1 : i32, i32, i32
  }
  func.func @transform_8(%arg0: i32) -> (i32, i32, i32) {
    %c0_i32 = arith.constant 0 : i32
    %c0_i32_0 = arith.constant 0 : i32
    %c0_i32_1 = arith.constant 0 : i32
    %c0_i32_2 = arith.constant 0 : i32
    return %c0_i32, %c0_i32_0, %c0_i32_1 : i32, i32, i32
  }
  func.func @transform_9(%arg0: i32) -> (i32, i32) {
    %c0_i32 = arith.constant 0 : i32
    %c0_i32_0 = arith.constant 0 : i32
    %c0_i32_1 = arith.constant 0 : i32
    return %c0_i32, %c0_i32_0 : i32, i32
  }
  func.func @transform_10(%arg0: i32) -> (i32, i32) {
    %c0_i32 = arith.constant 0 : i32
    %c0_i32_0 = arith.constant 0 : i32
    %c0_i32_1 = arith.constant 0 : i32
    return %c0_i32, %c0_i32_0 : i32, i32
  }
  func.func @transform_11(%arg0: i32) -> (i32, i32, i32) {
    %c0_i32 = arith.constant 0 : i32
    %c0_i32_0 = arith.constant 0 : i32
    %c0_i32_1 = arith.constant 0 : i32
    return %arg0, %c0_i32, %c0_i32_0 : i32, i32, i32
  }
}

</mosaic_0001>

<bundles_post_ra>
// kernel: tag_forward.1
= control target key start
LH: loop header
LB: loop body
LE: loop exit
PB: predicated region body
PF: predicated region fallthrough
CT: control target
= control target key end

     0   :  { %s2340_s19 = smov 0   ;;  %s3310_s0 = inlined_call_operand.vmem [shape: f32[2,8,256], index: 0, kind: input, shape index: {}]   ;;  %s3311_s1 = inlined_call_operand.vmem [shape: f32[2,1,256], index: 1, kind: input, shape index: {}]   ;;  %s3312_s2 = inlined_call_operand.vmem [shape: f32[9,256], index: 2, kind: input, shape index: {}]   ;;  %s3313_s3 = inlined_call_operand.vmem [shape: f32[3,8,72], index: 3, kind: input, shape index: {}]   ;;  %s3314_s4 = inlined_call_operand.vmem [shape: f32[3,8,1], index: 4, kind: input, shape index: {}]   ;;  %s3315_s5 = inlined_call_operand.vmem [shape: f32[8,24], index: 5, kind: input, shape index: {}]   ;;  %s3316_s6 = inlined_call_operand.vmem [shape: f32[8,1], index: 6, kind: input, shape index: {}]   ;;  %s3317_s7 = inlined_call_operand.vmem [shape: f32[3,8,72], index: 7, kind: input, shape index: {}]   ;;  %s3318_s8 = inlined_call_operand.vmem [shape: f32[3,8,1], index: 8, kind: input, shape index: {}]   ;;  %s3319_s9 = inlined_call_operand.vmem [shape: f32[1,72], index: 9, kind: input, shape index: {}]   ;;  %s3320_s10 = inlined_call_operand.<no memory space> [shape: f32[1,1], index: 10, kind: input, shape index: {}]   ;;  %s3321_s11 = inlined_call_operand.vmem [shape: f32[2,1,256], index: 11, kind: output, shape index: {}]  }
   0x1   :  { %v16_v0 = vstv %s3320_s10 }
   0x2   :  { %17 = vst [vmem:[#allocation2] sm:$0x1] %v16_v0 }
   0x3 LB: > { %s2079_s20 = sadd.s32 4294967295, %s2264_s19   ;;  %p2083_p0 = scmp.ge.s32.totalorder %s2264_s19, 1  ;;  %s2264_s19 = sphi %s2340_s19, %s23_s19  }
   0x4   : > { %p348_p1 = scmp.lt.s32.totalorder %s2264_s19, 3 }
   0x6   : > { %p349_p2 = pnand %p2083_p0, %p348_p1 }
   0x8   : > { %352 = sbr.rel (%p349_p2) target bundleno = 2156 (0x86c), region = 64 }
   0xf   : > { %p391_p3 = scmp.lt.s32.totalorder %s2079_s20, 1  ;;  %s2266_s28 = smov 17   ;;  %v3322_v7 = vlaneseq  ;;  %v3323_v15 = vmov 0.0   ;;  %v1049_v16 = vld [vmem:[%s3314_s4] sm:$0xff]  ;;  %v2099_v17 = vld [vmem:[%s3314_s4 + $0x8] sm:$0xff]  ;;  %v2275_v18 = vmov 0  }
  0x10   : > { %s2267_s29 = smov 16   ;;  %s2268_s30 = smov 15   ;;  %1123 = vmatprep.mubr.f32.mxu0 %v3323_v15  ;;  %1208 = vmatprep.mubr.f32.mxu1 %v3323_v15  ;;  %v2102_v19 = vld [vmem:[%s3314_s4 + $0x10] sm:$0xff]  ;;  %v1303_v20 = vld [vmem:[%s3316_s6] sm:$0xff]  ;;  %vm1055_vm8 = vcmask 588800   ;;  %vm1309_vm9 = vcmask 195584  }
  0x11   : > { %s3404_s20 = smov (!%p391_p3, %s2079_s20), 1  ;;  %s2269_s12 = smov 1   ;;  %v2388_v8 = vshrl.u32 %v3322_v7, 7  ;;  %2251 = vset.pattern.permute.xlu0 %v2275_v18  ;;  %2252 = vset.pattern.permute.xlu1 %v2275_v18  ;;  %v2455_v34 = vand.u32 127, %v3322_v7 }
  0x12   : > { %s2115_s10 = sshll.u32 %s3404_s20, 4  ;;  %s2086_s21 = sshll.u32 %s3404_s20, 1  ;;  %v404_v36 = vld [vmem:[%s3312_s2] ss:$8 sm:$0x3] }
  0x13   : > { %s395_s24 = scalar_lea.vmem %s3310_s0, %s2115_s10  ;;  %s2360_s27 = scalar_lea.vmem %s3311_s1, %s2086_s21  ;;  %3356 = vst [vmem:[#allocation5_spill] sm:$0xff] %v2388_v8  ;;  %v2391_v9 = vsub.s32 0, %v2388_v8  ;;  %v2396_v12 = vsub.s32 1, %v2388_v8  ;;  %v2088_v38 = vld [vmem:[%s3312_s2 + $0x1] ss:$8 sm:$0x3] }
  0x14   : > { %v2362_v1 = vld [vmem:[%s395_s24 + $0x8] sm:$0xff]  ;;  %v421_v2 = vld [vmem:[%s2360_s27] sm:$0x3]  ;;  %s2270_s13 = smov 127   ;;  %s2271_s14 = smov 113   ;;  %vm435_vm0 = vcmp.lt.s32.totalorder %v2455_v34, 17 }
  0x15   : > { %3354 = vst [vmem:[#allocation3_spill] sm:$0xff] %v2362_v1  ;;  %v2365_v3 = vld [vmem:[%s395_s24] sm:$0xff]  ;;  %v2095_v4 = vmul.f32 -1.442695, %v421_v2  ;;  %431 = vrot.lane.b32.xlu1 %v2362_v1, %s2266_s28  ;;  %3357 = vst [vmem:[#allocation6_spill] sm:$0xff] %v2396_v12  ;;  %s2272_s15 = smov 112   ;;  %v2473_v41 = vrot.slane %v404_v36, %v2391_v9  ;;  %v2476_v42 = vrot.slane %v404_v36, %v2396_v12 }
  0x16   : > { %3355 = vst [vmem:[#allocation4_spill] sm:$0xff] %v2365_v3  ;;  %429 = vrot.lane.b32.xlu0 %v2365_v3, %s2266_s28  ;;  %s2273_s16 = smov 111   ;;  %v2089_v39 = vld [vmem:[%s3312_s2 + $0x2] ss:$8 sm:$0x3]  ;;  %vm516_vm1 = vcmp.lt.s32.totalorder %v2455_v34, 16  ;;  %v2491_v52 = vrot.slane %v2088_v38, %v2391_v9  ;;  %v2494_v53 = vrot.slane %v2088_v38, %v2396_v12 }
  0x17   : > { %2253 = vpow2.f32 %v2095_v4  ;;  %vm586_vm2 = vcmp.lt.s32.totalorder %v2455_v34, 15  ;;  %v2090_v40 = vld [vmem:[%s3312_s2 + $0x3] ss:$8 sm:$0x3]  ;;  %3358 = vst [vmem:[#allocation7_spill] sm:$0xff] %v2473_v41  ;;  %3359 = vst [vmem:[#allocation8_spill] sm:$0xff] %v2476_v42  ;;  %v2497_v54 = vrot.slane %v2089_v39, %v2391_v9  ;;  %v2500_v55 = vrot.slane %v2089_v39, %v2396_v12 }
  0x18   : > { %vm656_vm3 = vcmp.lt.s32.totalorder %v2455_v34, 1  ;;  %v2091_v43 = vld [vmem:[%s3312_s2 + $0x5] ss:$8 sm:$0x3]  ;;  %3360 = vst [vmem:[#allocation9_spill] sm:$0xff] %v2491_v52  ;;  %3361 = vst [vmem:[#allocation10_spill] sm:$0xff] %v2494_v53  ;;  %v2503_v56 = vrot.slane %v2090_v40, %v2391_v9  ;;  %v2506_v57 = vrot.slane %v2090_v40, %v2396_v12 }
  0x19   : > { %514 = vrot.lane.b32.xlu1 %v2362_v1, %s2267_s29  ;;  %v2092_v47 = vld [vmem:[%s3312_s2 + $0x6] ss:$8 sm:$0x3]  ;;  %3362 = vst [vmem:[#allocation11_spill] sm:$0xff] %v2497_v54  ;;  %3363 = vst [vmem:[#allocation12_spill] sm:$0xff] %v2500_v55  ;;  %vm772_vm4 = vcmp.lt.s32.totalorder %v2455_v34, 127  ;;  %v2510_v58 = vrot.slane %v2091_v43, %v2391_v9  ;;  %v2516_v60 = vrot.slane %v2091_v43, %v2396_v12 }
  0x1a   : > { %512 = vrot.lane.b32.xlu0 %v2365_v3, %s2267_s29  ;;  %3364 = vst [vmem:[#allocation13_spill] sm:$0xff] %v2503_v56  ;;  %3365 = vst [vmem:[#allocation14_spill] sm:$0xff] %v2506_v57  ;;  %v2093_v59 = vld [vmem:[%s3312_s2 + $0x7] ss:$8 sm:$0x3]  ;;  %v2522_v0 = vrot.slane %v2092_v47, %v2391_v9  ;;  %v2525_v2 = vrot.slane %v2092_v47, %v2396_v12  ;;  %vm842_vm5 = vcmp.lt.s32.totalorder %v2455_v34, 113 }
  0x1b   : > { %3366 = vst [vmem:[#allocation15_spill] sm:$0xff] %v2510_v58  ;;  %3367 = vst [vmem:[#allocation16_spill] sm:$0xff] %v2516_v60  ;;  %v2094_v4 = vld [vmem:[%s3312_s2 + $0x10] ss:$8 sm:$0x3]  ;;  %vm912_vm6 = vcmp.lt.s32.totalorder %v2455_v34, 112 }
  0x1c   : > { %vm982_vm7 = vcmp.lt.s32.totalorder %v2455_v34, 111 }
  0x1d   : > { %584 = vrot.lane.b32.xlu1 %v2362_v1, %s2268_s30 }
  0x1e   : > { %582 = vrot.lane.b32.xlu0 %v2365_v3, %s2268_s30 }
  0x21   : > { %v2254_v5 = vpop.eup %2253  ;;  %654 = vrot.lane.b32.xlu1 %v2362_v1, %s2269_s12 }
  0x22   : > { %652 = vrot.lane.b32.xlu0 %v2365_v3, %s2269_s12  ;;  %v425_v6 = vadd.f32 1.0, %v2254_v5 }
  0x24   : > { %2255 = vrcp.f32 %v425_v6 }
  0x25   : > { %770 = vrot.lane.b32.xlu1 %v2362_v1, %s2270_s13 }
  0x26   : > { %768 = vrot.lane.b32.xlu0 %v2365_v3, %s2270_s13 }
  0x2e   : > { %v2256_v10 = vpop.eup %2255 }
  0x2f   : > { %v2393_v11 = vadd.f32 -0.5, %v2256_v10 }
  0x31   : > { %v455_v13 = vrot.slane %v2393_v11, %v2391_v9  ;;  %v459_v14 = vrot.slane %v2393_v11, %v2396_v12  ;;  %v737_v29 = vsub.f32 0.0, %v2393_v11  ;;  %v722_v30 = vmax.f32 %v2393_v11, 0.0 }
  0x32   : > { %v753_v51 = vand.u32 2147483647, %v2393_v11 }
  0x33   : > { %532 = vrot.lane.b32.xlu1 %v455_v13, %s2267_s29  ;;  %462 = vrot.lane.b32.xlu0 %v455_v13, %s2266_s28  ;;  %v738_v31 = vmax.f32 %v737_v29, 0.0  ;;  %v723_v35 = vmin.f32 %v722_v30, 1.0  ;;  %v2558_v29 = vrot.slane %v2094_v4, %v2391_v9 }
  0x34   : > { %v2539_v11 = vsub.f32 0.5, %v753_v51 }
  0x35   : > { %v739_v37 = vmin.f32 %v738_v31, 1.0  ;;  %v732_v46 = vrot.slane %v723_v35, %v2396_v12  ;;  %v728_v48 = vrot.slane %v723_v35, %v2391_v9 }
  0x36   : > { %3368 = vst [vmem:[#allocation17_spill] sm:$0xff] %v2539_v11 }
  0x37   : > { %534 = vrot.lane.b32.xlu1 %v459_v14, %s2267_s29  ;;  %464 = vrot.lane.b32.xlu0 %v459_v14, %s2266_s28  ;;  %v748_v49 = vrot.slane %v739_v37, %v2396_v12  ;;  %v744_v50 = vrot.slane %v739_v37, %v2391_v9  ;;  %v2519_v63 = vmul.f32 %v732_v46, %v2362_v1 }
  0x38   : > { %v2531_v5 = vmul.f32 %v728_v48, %v2365_v3 }
  0x39   : > { %v2534_v6 = vmul.f32 %v748_v49, %v2362_v1  ;;  %v2537_v10 = vmul.f32 %v744_v50, %v2365_v3 }
  0x3b   : > { %604 = vrot.lane.b32.xlu1 %v459_v14, %s2268_s30  ;;  %602 = vrot.lane.b32.xlu0 %v455_v13, %s2268_s30 }
  0x3f   : > { %674 = vrot.lane.b32.xlu1 %v459_v14, %s2269_s12  ;;  %672 = vrot.lane.b32.xlu0 %v455_v13, %s2269_s12 }
  0x43   : > { %790 = vrot.lane.b32.xlu1 %v459_v14, %s2270_s13  ;;  %788 = vrot.lane.b32.xlu0 %v455_v13, %s2270_s13 }
  0x47   : > { %860 = vrot.lane.b32.xlu1 %v459_v14, %s2271_s14  ;;  %858 = vrot.lane.b32.xlu0 %v455_v13, %s2271_s14 }
  0x4b   : > { %930 = vrot.lane.b32.xlu1 %v459_v14, %s2272_s15  ;;  %928 = vrot.lane.b32.xlu0 %v455_v13, %s2272_s15 }
  0x4f   : > { %840 = vrot.lane.b32.xlu1 %v2362_v1, %s2271_s14  ;;  %838 = vrot.lane.b32.xlu0 %v2365_v3, %s2271_s14 }
  0x53   : > { %910 = vrot.lane.b32.xlu1 %v2362_v1, %s2272_s15  ;;  %908 = vrot.lane.b32.xlu0 %v2365_v3, %s2272_s15 }
  0x57   : > { %1000 = vrot.lane.b32.xlu1 %v459_v14, %s2273_s16  ;;  %998 = vrot.lane.b32.xlu0 %v455_v13, %s2273_s16 }
  0x5b   : > { %980 = vrot.lane.b32.xlu1 %v2362_v1, %s2273_s16  ;;  %978 = vrot.lane.b32.xlu0 %v2365_v3, %s2273_s16 }
  0x5f   : > { %1052 = vperm.xlu0 %2251, %v1049_v16   ;;  %1138 = vperm.xlu1 %2252, %v2099_v17   ;;  %v2546_v16 = vrot.slane %v2093_v59, %v2391_v9  ;;  %v2549_v17 = vrot.slane %v2093_v59, %v2396_v12 }
  0x63   : > { %1223 = vperm.xlu1 %2252, %v2102_v19   ;;  %1306 = vperm.xlu0 %2251, %v1303_v20  }
  0x87   : > { %v432_v21 = vpop.permute.xlu1 %431 }
  0x88   : > { %v430_v22 = vpop.permute.xlu0 %429 }
  0x89   : > { %v436_v13 = vsel %vm435_vm0, %v430_v22, %v432_v21  ;;  %v437_v14 = vsel %vm435_vm0, %v432_v21, %v430_v22 }
  0x8a   : > { %v2575_v36 = vmul.f32 %v2476_v42, %v436_v13 }
  0x8b   : > { %v515_v23 = vpop.permute.xlu1 %514 }
  0x8c   : > { %v513_v24 = vpop.permute.xlu0 %512 }
  0x8d   : > { %v517_v18 = vsel %vm516_vm1, %v513_v24, %v515_v23  ;;  %v518_v19 = vsel %vm516_vm1, %v515_v23, %v513_v24  ;;  %v2569_v23 = vrot.slane %v2094_v4, %v2396_v12  ;;  %v2572_v24 = vmul.f32 %v2473_v41, %v437_v14 }
  0x8e   : > { %v2585_v38 = vmul.f32 %v2494_v53, %v517_v18 }
  0x8f   : > { %v585_v25 = vpop.permute.xlu1 %584 }
  0x90   : > { %v583_v26 = vpop.permute.xlu0 %582 }
  0x91   : > { %v587_v21 = vsel %vm586_vm2, %v583_v26, %v585_v25  ;;  %v588_v22 = vsel %vm586_vm2, %v585_v25, %v583_v26  ;;  %v2582_v26 = vmul.f32 %v2491_v52, %v518_v19 }
  0x92   : > { %v2592_v43 = vmul.f32 %v2497_v54, %v588_v22 }
  0x93   : > { %v2444_v27 = vpop.permute.xlu1 %654 }
  0x94   : > { %v2446_v28 = vpop.permute.xlu0 %652 }
  0x95   : > { %v658_v30 = vsel %vm656_vm3, %v2444_v27, %v2446_v28  ;;  %v657_v39 = vsel %vm656_vm3, %v2446_v28, %v2444_v27 }
  0x96   : > { %v2598_v46 = vmul.f32 %v2503_v56, %v658_v30  ;;  %v2609_v59 = vmul.f32 %v2506_v57, %v657_v39 }
  0x97   : > { %v2450_v32 = vpop.permute.xlu1 %770 }
  0x98   : > { %v2452_v33 = vpop.permute.xlu0 %768 }
  0x99   : > { %v773_v47 = vsel %vm772_vm4, %v2452_v33, %v2450_v32 }
  0x9a   : > { %v2616_v14 = vmul.f32 %v2510_v58, %v773_v47 }
  0xa5   : > { %v533_v44 = vpop.permute.xlu1 %532  ;;  %v463_v45 = vpop.permute.xlu0 %462 }
  0xa9   : > { %v535_v61 = vpop.permute.xlu1 %534  ;;  %v465_v62 = vpop.permute.xlu0 %464 }
  0xaa   : > { %v537_v20 = vsel %vm516_vm1, %v535_v61, %v533_v44  ;;  %v536_v37 = vsel %vm516_vm1, %v533_v44, %v535_v61  ;;  %v2595_v44 = vmul.f32 %v2500_v55, %v587_v21  ;;  %v466_v27 = vsel %vm435_vm0, %v463_v45, %v465_v62 }
  0xab   : > { %v568_v40 = vand.u32 2147483647, %v537_v20  ;;  %v552_v48 = vsub.f32 0.0, %v537_v20  ;;  %v553_v49 = vsub.f32 0.0, %v536_v37  ;;  %v467_v28 = vsel %vm435_vm0, %v465_v62, %v463_v45 }
  0xac   : > { %v774_v61 = vsel %vm772_vm4, %v2450_v32, %v2452_v33  ;;  %v538_v4 = vmax.f32 %v537_v20, 0.0  ;;  %v569_v13 = vand.u32 2147483647, %v536_v37  ;;  %v539_v18 = vmax.f32 %v536_v37, 0.0 }
  0xad   : > { %v605_v31 = vpop.permute.xlu1 %604  ;;  %v603_v35 = vpop.permute.xlu0 %602  ;;  %v570_v19 = vsub.f32 0.5, %v568_v40  ;;  %v469_v62 = vmax.f32 %v466_v27, 0.0  ;;  %v482_v21 = vsub.f32 0.0, %v467_v28  ;;  %v498_v22 = vand.u32 2147483647, %v467_v28 }
  0xae   : > { %v2620_v45 = vsel %vm586_vm2, %v605_v31, %v603_v35  ;;  %v606_v30 = vsel %vm586_vm2, %v603_v35, %v605_v31  ;;  %v2625_v39 = vmul.f32 %v2516_v60, %v774_v61  ;;  %v2627_v32 = vmax.f32 %v552_v48, 0.0 }
  0xaf   : > { %v2629_v33 = vmax.f32 %v553_v49, 0.0  ;;  %v468_v20 = vmax.f32 %v467_v28, 0.0  ;;  %v2631_v37 = vmin.f32 %v538_v4, 1.0  ;;  %v2633_v40 = vsub.f32 0.5, %v569_v13 }
  0xb0   : > { %v483_v47 = vsub.f32 0.0, %v466_v27  ;;  %v622_v7 = vsub.f32 0.0, %v2620_v45  ;;  %v541_v31 = vmin.f32 %v539_v18, 1.0  ;;  %v575_v35 = vrot.slane %v570_v19, %v2391_v9 }
  0xb1   : > { %v675_v50 = vpop.permute.xlu1 %674  ;;  %v673_v51 = vpop.permute.xlu0 %672  ;;  %v499_v61 = vand.u32 2147483647, %v466_v27  ;;  %v623_v48 = vsub.f32 0.0, %v606_v30  ;;  %v471_v8 = vmin.f32 %v469_v62, 1.0  ;;  %v2641_v49 = vmax.f32 %v482_v21, 0.0 }
  0xb2   : > { %v500_v28 = vsub.f32 0.5, %v498_v22  ;;  %v608_v4 = vmax.f32 %v2620_v45, 0.0  ;;  %v557_v60 = vmin.f32 %v2629_v33, 1.0  ;;  %v470_v58 = vmin.f32 %v468_v20, 1.0 }
  0xb3   : > { %v609_v57 = vmax.f32 %v606_v30, 0.0  ;;  %v485_v18 = vmax.f32 %v483_v47, 0.0  ;;  %v624_v55 = vmax.f32 %v622_v7, 0.0  ;;  %v676_v27 = vsel %vm656_vm3, %v673_v51, %v675_v50 }
  0xb4   : > { %v2651_v19 = vmul.f32 %v575_v35, %v2582_v26  ;;  %v2653_v62 = vsub.f32 0.5, %v499_v61  ;;  %v625_v21 = vmax.f32 %v623_v48, 0.0  ;;  %v639_v22 = vand.u32 2147483647, %v606_v30 }
  0xb5   : > { %v2636_v15 = vpop.permute.xlu1 %790  ;;  %v2638_v25 = vpop.permute.xlu0 %788  ;;  %v486_v13 = vmin.f32 %v2641_v49, 1.0  ;;  %v505_v33 = vrot.slane %v500_v28, %v2391_v9  ;;  %v2657_v20 = vmin.f32 %v608_v4, 1.0  ;;  %v479_v56 = vrot.slane %v471_v8, %v2391_v9 }
  0xb6   : > { %3369 = vst [vmem:[#allocation18_spill] sm:$0xff] %v2651_v19  ;;  %v2660_v54 = vmin.f32 %v609_v57, 1.0  ;;  %v2664_v35 = vsel %vm656_vm3, %v675_v50, %v673_v51  ;;  %v679_v61 = vmax.f32 %v676_v27, 0.0  ;;  %v549_v48 = vrot.slane %v541_v31, %v2391_v9 }
  0xb7   : > { %v626_v30 = vmin.f32 %v624_v55, 1.0  ;;  %v638_v49 = vand.u32 2147483647, %v2620_v45  ;;  %v693_v28 = vsub.f32 0.0, %v676_v27  ;;  %v481_v4 = vmul.f32 %v479_v56, %v2575_v36 }
  0xb8   : > { %v487_v8 = vmin.f32 %v485_v18, 1.0  ;;  %v627_v53 = vmin.f32 %v625_v21, 1.0  ;;  %v2670_v52 = vsub.f32 0.5, %v639_v22  ;;  %v551_v57 = vmul.f32 %v549_v48, %v2585_v38 }
  0xb9   : > { %v861_v47 = vpop.permute.xlu1 %860  ;;  %v859_v7 = vpop.permute.xlu0 %858  ;;  %v2676_v51 = vmul.f32 %v505_v33, %v2572_v24  ;;  %v678_v45 = vmax.f32 %v2664_v35, 0.0  ;;  %v619_v56 = vrot.slane %v2660_v54, %v2391_v9  ;;  %v2683_v31 = vmin.f32 %v679_v61, 1.0 }
  0xba   : > { %3370 = vst [vmem:[#allocation19_spill] sm:$0xff] %v2670_v52  ;;  %v692_v18 = vsub.f32 0.0, %v2664_v35  ;;  %v2116_v21 = vpack.c.bf16 %v551_v57, %v481_v4  ;;  %v2687_v22 = vrot.slane %v626_v30, %v2391_v9  ;;  %v2689_v48 = vsub.f32 0.5, %v638_v49 }
  0xbb   : > { %3371 = vst [vmem:[#allocation20_spill] sm:$0xff] %v2676_v51  ;;  %v695_v33 = vmax.f32 %v693_v28, 0.0  ;;  %v709_v50 = vand.u32 2147483647, %v676_v27  ;;  %v2694_v41 = vrot.slane %v627_v53, %v2391_v9  ;;  %v475_v61 = vrot.slane %v470_v58, %v2391_v9 }
  0xbc   : > { %2117 = vmatprep.subr.bf16.mxu0 %v2116_v21  ;;  %v545_v30 = vrot.slane %v2631_v37, %v2391_v9  ;;  %v2702_v49 = vmin.f32 %v678_v45, 1.0  ;;  %v708_v27 = vand.u32 2147483647, %v2664_v35  ;;  %v2709_v53 = vsel %vm772_vm4, %v2638_v25, %v2636_v15 }
  0xbd   : > { %v2691_v42 = vpop.permute.xlu1 %930  ;;  %v929_v55 = vpop.permute.xlu0 %928  ;;  %v2715_v58 = vsel %vm772_vm4, %v2636_v15, %v2638_v25  ;;  %v689_v37 = vrot.slane %v2683_v31, %v2391_v9  ;;  %v694_v28 = vmax.f32 %v692_v18, 0.0  ;;  %v480_v4 = vmul.f32 %v475_v61, %v2572_v24 }
  0xbe   : > { %v550_v35 = vmul.f32 %v545_v30, %v2582_v26  ;;  %v697_v57 = vmin.f32 %v695_v33, 1.0  ;;  %v2721_v45 = vsub.f32 0.5, %v709_v50  ;;  %v495_v21 = vrot.slane %v487_v8, %v2391_v9 }
  0xbf   : > { %v565_v54 = vrot.slane %v557_v60, %v2391_v9  ;;  %v808_v3 = vsub.f32 0.0, %v2709_v53  ;;  %v809_v15 = vsub.f32 0.0, %v2715_v58  ;;  %v491_v19 = vrot.slane %v486_v13, %v2391_v9 }
  0xc0   : > { %v2118_v25 = vpack.c.bf16 %v550_v35, %v480_v4  ;;  %v497_v31 = vmul.f32 %v495_v21, %v2575_v36  ;;  %v3372_v33 = vmin.f32 %v2627_v32, 1.0  ;;  %v2735_v8 = vsel %vm842_vm5, %v859_v7, %v861_v47 }
  0xc1   : > { %v567_v18 = vmul.f32 %v565_v54, %v2585_v38  ;;  %3373 = vst [vmem:[#allocation21_spill] sm:$0xff] %v2735_v8  ;;  %v2737_v60 = vpop.permute.xlu1 %840  ;;  %v2739_v61 = vpop.permute.xlu0 %838  ;;  %v696_v30 = vmin.f32 %v694_v28, 1.0  ;;  %v794_v4 = vmax.f32 %v2709_v53, 0.0  ;;  %v496_v13 = vmul.f32 %v491_v19, %v2572_v24 }
  0xc2   : > { %v561_v50 = vrot.slane %v3372_v33, %v2391_v9  ;;  %2119 = vmatpush1.bf16.msra.mxu0 %v2118_v25  ;;  %v2745_v54 = vsel %vm842_vm5, %v861_v47, %v859_v7  ;;  %v685_v32 = vrot.slane %v2702_v49, %v2391_v9  ;;  %v795_v35 = vmax.f32 %v2715_v58, 0.0 }
  0xc3   : > { %v2132_v21 = vpack.c.bf16 %v567_v18, %v497_v31  ;;  %v705_v51 = vrot.slane %v697_v57, %v2391_v9  ;;  %v2752_v28 = vsub.f32 0.5, %v708_v27  ;;  %v878_v25 = vsub.f32 0.0, %v2735_v8 }
  0xc4   : > { %v566_v33 = vmul.f32 %v561_v50, %v2582_v26  ;;  %v879_v24 = vsub.f32 0.0, %v2745_v54  ;;  %v810_v19 = vmax.f32 %v808_v3, 0.0  ;;  %v811_v12 = vmax.f32 %v809_v15, 0.0 }
  0xc5   : > { %2133 = vmatprep.subr.bf16.mxu1 %v2132_v21  ;;  %v864_v7 = vmax.f32 %v2735_v8, 0.0  ;;  %v701_v49 = vrot.slane %v696_v30, %v2391_v9  ;;  %v796_v26 = vmin.f32 %v794_v4, 1.0  ;;  %v797_v27 = vmin.f32 %v795_v35, 1.0  ;;  %v2768_v15 = vpop.permute.xlu1 %910  ;;  %v2770_v30 = vpop.permute.xlu0 %908 }
  0xc6   : > { %v2134_v47 = vpack.c.bf16 %v566_v33, %v496_v13  ;;  %v621_v18 = vmul.f32 %v619_v56, %v2595_v44  ;;  %v691_v50 = vmul.f32 %v689_v37, %v2609_v59  ;;  %v2766_v3 = vsel %vm912_vm6, %v929_v55, %v2691_v42 }
  0xc7   : > { %v865_v13 = vmax.f32 %v2745_v54, 0.0  ;;  %v880_v4 = vmax.f32 %v878_v25, 0.0  ;;  %v881_v21 = vmax.f32 %v879_v24, 0.0  ;;  %v2776_v35 = vsel %vm912_vm6, %v2691_v42, %v929_v55 }
  0xc8   : > { %2135 = vmatpush1.bf16.msra.mxu1 %v2134_v47  ;;  %v812_v56 = vmin.f32 %v810_v19, 1.0  ;;  %v813_v37 = vmin.f32 %v811_v12, 1.0  ;;  %v2778_v33 = vmin.f32 %v864_v7, 1.0  ;;  %v2120_v47 = vpack.c.bf16 %v691_v50, %v621_v18 }
  0xc9   : > { %v934_v57 = vmax.f32 %v2766_v3, 0.0  ;;  %v948_v8 = vsub.f32 0.0, %v2766_v3  ;;  %v949_v1 = vsub.f32 0.0, %v2776_v35  ;;  %v801_v25 = vrot.slane %v796_v26, %v2391_v9  ;;  %v1001_v52 = vpop.permute.xlu1 %1000  ;;  %v999_v11 = vpop.permute.xlu0 %998 }
  0xca   : > { %v805_v42 = vrot.slane %v797_v27, %v2391_v9  ;;  %2121 = vmatprep.subr.bf16.mxu0 %v2120_v47  ;;  %v3374_v12 = vrot.slane %v2657_v20, %v2391_v9  ;;  %v690_v24 = vmul.f32 %v685_v32, %v2598_v46  ;;  %v2792_v19 = vmin.f32 %v865_v13, 1.0 }
  0xcb   : > { %v882_v7 = vmin.f32 %v880_v4, 1.0  ;;  %v883_v18 = vmin.f32 %v881_v21, 1.0  ;;  %v935_v50 = vmax.f32 %v2776_v35, 0.0  ;;  %v817_v31 = vrot.slane %v812_v56, %v2391_v9 }
  0xcc   : > { %v620_v55 = vmul.f32 %v3374_v12, %v2592_v43  ;;  %v821_v26 = vrot.slane %v813_v37, %v2391_v9  ;;  %v871_v27 = vrot.slane %v2778_v33, %v2391_v9  ;;  %v2799_v20 = vmin.f32 %v934_v57, 1.0 }
  0xcd   : > { %v950_v12 = vmax.f32 %v948_v8, 0.0  ;;  %v951_v32 = vmax.f32 %v949_v1, 0.0  ;;  %v637_v13 = vmul.f32 %v2694_v41, %v2595_v44  ;;  %v707_v4 = vmul.f32 %v705_v51, %v2609_v59 }
  0xce   : > { %v2122_v47 = vpack.c.bf16 %v690_v24, %v620_v55  ;;  %v636_v21 = vmul.f32 %v2687_v22, %v2592_v43  ;;  %v706_v56 = vmul.f32 %v701_v49, %v2598_v46  ;;  %v807_v37 = vmul.f32 %v805_v42, %v2625_v39 }
  0xcf   : > { %v875_v55 = vrot.slane %v2792_v19, %v2391_v9  ;;  %v887_v57 = vrot.slane %v882_v7, %v2391_v9  ;;  %v891_v1 = vrot.slane %v883_v18, %v2391_v9  ;;  %v937_v8 = vmin.f32 %v935_v50, 1.0 }
  0xd0   : > { %2123 = vmatpush1.bf16.msra.mxu0 %v2122_v47  ;;  %v2136_v24 = vpack.c.bf16 %v707_v4, %v637_v13  ;;  %v2138_v41 = vpack.c.bf16 %v706_v56, %v636_v21  ;;  %v2124_v47 = vpack.c.bf16 %v807_v37, %v2519_v63  ;;  %v844_v51 = vsel %vm842_vm5, %v2737_v60, %v2739_v61 }
  0xd1   : > { %v941_v22 = vrot.slane %v2799_v20, %v2391_v9  ;;  %v806_v49 = vmul.f32 %v801_v25, %v2616_v14  ;;  %v823_v42 = vmul.f32 %v821_v26, %v2625_v39  ;;  %v822_v19 = vmul.f32 %v817_v31, %v2616_v14  ;;  %v981_v20 = vpop.permute.xlu1 %980  ;;  %v979_v25 = vpop.permute.xlu0 %978 }
  0xd2   : > { %v952_v7 = vmin.f32 %v950_v12, 1.0  ;;  %v953_v18 = vmin.f32 %v951_v32, 1.0  ;;  %2137 = vmatprep.subr.bf16.mxu1 %v2136_v24  ;;  %2125 = vmatprep.subr.bf16.mxu0 %v2124_v47  ;;  %v843_v63 = vsel %vm842_vm5, %v2739_v61, %v2737_v60  ;;  %v914_v50 = vsel %vm912_vm6, %v2768_v15, %v2770_v30 }
  0xd3   : > { %2139 = vmatpush1.bf16.msra.mxu1 %v2138_v41  ;;  %v2831_v26 = vmul.f32 %v2525_v2, %v844_v51  ;;  %v2126_v31 = vpack.c.bf16 %v806_v49, %v2531_v5  ;;  %v2140_v12 = vpack.c.bf16 %v823_v42, %v2534_v6  ;;  %v2142_v32 = vpack.c.bf16 %v822_v19, %v2537_v10 }
  0xd4   : > { %v913_v60 = vsel %vm912_vm6, %v2770_v30, %v2768_v15  ;;  %v2841_v61 = vmul.f32 %v2549_v17, %v914_v50  ;;  %v2845_v13 = vsel %vm982_vm7, %v999_v11, %v1001_v52  ;;  %v2849_v4 = vsel %vm982_vm7, %v1001_v52, %v999_v11 }
  0xd5   : > { %2127 = vmatpush1.bf16.msra.mxu0 %v2126_v31  ;;  %2141 = vmatprep.subr.bf16.mxu1 %v2140_v12  ;;  %v1004_v5 = vmax.f32 %v2845_v13, 0.0  ;;  %v1005_v6 = vmax.f32 %v2849_v4, 0.0  ;;  %v1018_v10 = vsub.f32 0.0, %v2845_v13  ;;  %v983_v15 = vsel %vm982_vm7, %v979_v25, %v981_v20 }
  0xd6   : > { %v945_v30 = vrot.slane %v937_v8, %v2391_v9  ;;  %v2858_v21 = vmul.f32 %v2522_v0, %v843_v63  ;;  %v1019_v56 = vsub.f32 0.0, %v2849_v4  ;;  %v984_v52 = vsel %vm982_vm7, %v981_v20, %v979_v25 }
  0xd7   : > { %v957_v11 = vrot.slane %v952_v7, %v2391_v9  ;;  %v961_v37 = vrot.slane %v953_v18, %v2391_v9  ;;  %2143 = vmatpush1.bf16.msra.mxu1 %v2142_v32  ;;  %v2866_v24 = vmul.f32 %v2546_v16, %v913_v60  ;;  %v1020_v41 = vmax.f32 %v1018_v10, 0.0 }
  0xd8   : > { %v1006_v47 = vmin.f32 %v1004_v5, 1.0  ;;  %v1007_v51 = vmin.f32 %v1005_v6, 1.0  ;;  %v1021_v8 = vmax.f32 %v1019_v56, 0.0  ;;  %v2869_v49 = vmul.f32 %v2558_v29, %v983_v15 }
  0xd9   : > { %v1022_v42 = vmin.f32 %v1020_v41, 1.0  ;;  %v2872_v19 = vmul.f32 %v2569_v23, %v984_v52  ;;  %v877_v63 = vmul.f32 %v875_v55, %v2831_v26  ;;  %v947_v7 = vmul.f32 %v945_v30, %v2841_v61 }
  0xda   : > { %v1023_v18 = vmin.f32 %v1021_v8, 1.0  ;;  %v893_v50 = vmul.f32 %v891_v1, %v2831_v26  ;;  %v963_v20 = vmul.f32 %v961_v37, %v2841_v61  ;;  %v876_v25 = vmul.f32 %v871_v27, %v2858_v21 }
  0xdb   : > { %v2128_v31 = vpack.c.bf16 %v947_v7, %v877_v63  ;;  %v946_v12 = vmul.f32 %v941_v22, %v2866_v24  ;;  %v892_v32 = vmul.f32 %v887_v57, %v2858_v21  ;;  %v962_v60 = vmul.f32 %v957_v11, %v2866_v24 }
  0xdc   : > { %v3375_v55 = vand.u32 2147483647, %v2715_v58  ;;  %v2144_v6 = vpack.c.bf16 %v963_v20, %v893_v50  ;;  %v1015_v1 = vrot.slane %v1007_v51, %v2391_v9  ;;  %v1011_v10 = vrot.slane %v1006_v47, %v2391_v9  ;;  %v3383_v50 = vld [vmem:[#allocation3_spill] sm:$0xff]  ;;  %v3384_v20 = vld [vmem:[#allocation6_spill] sm:$0xff] }
  0xdd   : > { %v965_v15 = vand.u32 2147483647, %v2776_v35  ;;  %2129 = vmatprep.subr.bf16.mxu0 %v2128_v31  ;;  %v2130_v33 = vpack.c.bf16 %v946_v12, %v876_v25  ;;  %v2146_v27 = vpack.c.bf16 %v962_v60, %v892_v32  ;;  %v1031_v30 = vrot.slane %v1023_v18, %v2391_v9  ;;  %v3386_v60 = vld [vmem:[#allocation21_spill] sm:$0xff] }
  0xde   : > { %v827_v5 = vsub.f32 0.5, %v3375_v55  ;;  %2145 = vmatprep.subr.bf16.mxu1 %v2144_v6  ;;  %v1017_v57 = vmul.f32 %v1015_v1, %v2872_v19  ;;  %v3376_v58 = vrot.slane %v2653_v62, %v2391_v9  ;;  %v3377_v56 = vrot.slane %v2633_v40, %v2391_v9  ;;  %v3388_v6 = vld [vmem:[#allocation18_spill] sm:$0xff] }
  0xdf   : > { %v1027_v35 = vrot.slane %v1022_v42, %v2391_v9  ;;  %v715_v11 = vrot.slane %v2752_v28, %v2391_v9  ;;  %v3378_v37 = vand.u32 2147483647, %v2709_v53  ;;  %2131 = vmatpush1.bf16.msra.mxu0 %v2130_v33  ;;  %2147 = vmatpush1.bf16.msra.mxu1 %v2146_v27  ;;  %v1016_v47 = vmul.f32 %v1011_v10, %v2869_v49  ;;  %v1048_v42 = vld [vmem:[%s3313_s3] sm:$0xff] }
  0xe0   : > { %v511_v22 = vmul.f32 %v3376_v58, %v2575_v36  ;;  %v581_v52 = vmul.f32 %v3377_v56, %v2585_v38  ;;  %v1033_v62 = vmul.f32 %v1031_v30, %v2872_v19  ;;  %v835_v36 = vrot.slane %v827_v5, %v2391_v9  ;;  %1075 = vmatprep.subr.mxu0 %v1017_v57  ;;  %v3387_v5 = vld [vmem:[#allocation20_spill] sm:$0xff] }
  0xe1   : > { %v826_v41 = vsub.f32 0.5, %v3378_v37  ;;  %v895_v51 = vand.u32 2147483647, %v2745_v54  ;;  %v1032_v38 = vmul.f32 %v1027_v35, %v2869_v49  ;;  %v3379_v40 = vrot.slane %v2721_v45, %v2391_v9  ;;  %v3380_v54 = vld [vmem:[#allocation17_spill] sm:$0xff]  ;;  %v3381_v45 = vld [vmem:[#allocation19_spill] sm:$0xff]  ;;  %v3389_v57 = vld [vmem:[#allocation4_spill] sm:$0xff] }
  0xe2   : > { %v645_v53 = vrot.slane %v2689_v48, %v2391_v9  ;;  %v964_v8 = vand.u32 2147483647, %v2766_v3  ;;  %1160 = vmatprep.subr.mxu1 %v1033_v62  ;;  %v759_v63 = vrot.slane %v3380_v54, %v2391_v9  ;;  %v967_v7 = vsub.f32 0.5, %v965_v15 }
  0xe3   : > { %v721_v28 = vmul.f32 %v3379_v40, %v2609_v59  ;;  %v2148_v18 = vpack.c.bf16 %v581_v52, %v511_v22  ;;  %v2098_v59 = vld [vmem:[%s3313_s3 + $0x8] sm:$0xff]  ;;  %v3382_v48 = vrot.slane %v3381_v45, %v2391_v9  ;;  %v3385_v25 = vrot.slane %v3380_v54, %v3384_v20  ;;  %1076 = vmatpush1.msra.mxu0 %v1016_v47 }
  0xe4   : > { %v720_v12 = vmul.f32 %v715_v11, %v2598_v46  ;;  %v831_v32 = vrot.slane %v826_v41, %v2391_v9  ;;  %v894_v55 = vand.u32 2147483647, %v3386_v60  ;;  %1161 = vmatpush1.msra.mxu1 %v1032_v38  ;;  %v2150_v1 = vpack.c.bf16 %v3388_v6, %v3387_v5  ;;  %2097 = vmatmul.mubr.msk.f32.vlgmr.msra.gmra.mrb[0].mxu0 %vm1055_vm8, %v1048_v42 }
  0xe5   : > { %v651_v3 = vmul.f32 %v3382_v48, %v2595_v44  ;;  %v767_v31 = vmul.f32 %v3385_v25, %v3383_v50  ;;  %v897_v10 = vsub.f32 0.5, %v895_v51  ;;  %v1035_v15 = vand.u32 2147483647, %v2849_v4  ;;  %2149 = vmatprep.subr.bf16.mxu0 %v2148_v18  ;;  %2100 = vmatmul.mubr.msk.f32.vlgmr.msra.gmra.mrb[0].mxu1 %vm1055_vm8, %v2098_v59 }
  0xe6   : > { %v837_v33 = vmul.f32 %v835_v36, %v2625_v39  ;;  %v650_v46 = vmul.f32 %v645_v53, %v2592_v43  ;;  %v966_v27 = vsub.f32 0.5, %v964_v8  ;;  %2151 = vmatpush1.bf16.msra.mxu0 %v2150_v1  ;;  %v975_v30 = vrot.slane %v967_v7, %v2391_v9  ;;  %v1139_v8 = vpop.permute.xlu1 %1138 }
  0xe7   : > { %v2152_v44 = vpack.c.bf16 %v721_v28, %v651_v3  ;;  %v766_v58 = vmul.f32 %v759_v63, %v3389_v57  ;;  %v3390_v22 = vmov 0.0   ;;  %v836_v4 = vmul.f32 %v831_v32, %v2616_v14 }
  0xe8   : > { %1293 = vmatprep.mubr.f32.mxu0 %v3390_v22  ;;  %v896_v56 = vsub.f32 0.5, %v894_v55  ;;  %v1034_v52 = vand.u32 2147483647, %v2845_v13  ;;  %v2154_v35 = vpack.c.bf16 %v720_v12, %v650_v46  ;;  %1377 = vmatprep.mubr.f32.mxu1 %v3390_v22  ;;  %v905_v43 = vrot.slane %v897_v10, %v2391_v9  ;;  %v1302_v10 = vld [vmem:[%s3315_s5] sm:$0xff] }
  0xe9   : > { %2153 = vmatprep.subr.bf16.mxu0 %v2152_v44  ;;  %v1037_v39 = vsub.f32 0.5, %v1035_v15  ;;  %v2156_v11 = vpack.c.bf16 %v837_v33, %v767_v31  ;;  %v977_v37 = vmul.f32 %v975_v30, %v2841_v61  ;;  %v971_v41 = vrot.slane %v966_v27, %v2391_v9  ;;  %v1385_v30 = vld [vmem:[%s3318_s8] sm:$0xff] }
  0xea   : > { %2155 = vmatpush1.bf16.msra.mxu0 %v2154_v35  ;;  %v907_v47 = vmul.f32 %v905_v43, %v2831_v26  ;;  %v901_v14 = vrot.slane %v896_v56, %v2391_v9  ;;  %v1036_v13 = vsub.f32 0.5, %v1034_v52  ;;  %v2158_v36 = vpack.c.bf16 %v836_v4, %v766_v58  ;;  %v1224_v12 = vpop.permute.xlu1 %1223 }
  0xeb   : > { %2157 = vmatprep.subr.bf16.mxu0 %v2156_v11  ;;  %v976_v62 = vmul.f32 %v971_v41, %v2866_v24  ;;  %v1045_v38 = vrot.slane %v1037_v39, %v2391_v9  ;;  %v2101_v24 = vld [vmem:[%s3313_s3 + $0x10] sm:$0xff]  ;;  %v3391_v11 = vld [vmem:[#allocation7_spill] sm:$0xff] }
  0xec   : > { %v2160_v51 = vpack.c.bf16 %v977_v37, %v907_v47  ;;  %v906_v40 = vmul.f32 %v901_v14, %v2858_v21  ;;  %v1041_v61 = vrot.slane %v1036_v13, %v2391_v9  ;;  %v1053_v21 = vpop.permute.xlu0 %1052  ;;  %v3392_v41 = vld [vmem:[#allocation8_spill] sm:$0xff]  ;;  %v3393_v14 = vld [vmem:[#allocation9_spill] sm:$0xff]  ;;  %v3394_v13 = vld [vmem:[#allocation10_spill] sm:$0xff] }
  0xed   : > { %v1047_v53 = vmul.f32 %v1045_v38, %v2872_v19 }
  0xee   : > { %2159 = vmatpush1.bf16.msra.mxu0 %v2158_v36  ;;  %v2162_v28 = vpack.c.bf16 %v976_v62, %v906_v40  ;;  %v1046_v26 = vmul.f32 %v1041_v61, %v2869_v49 }
  0xef   : > { %2161 = vmatprep.subr.bf16.mxu0 %v2160_v51 }
  0xf0   : > { %v1307_v15 = vpop.permute.xlu0 %1306 }
  0xf2   : > { %2163 = vmatpush1.bf16.msra.mxu0 %v2162_v28 }
  0xf3   : > { %1245 = vmatprep.subr.mxu0 %v1047_v53 }
  0xf6   : > { %1246 = vmatpush1.msra.mxu0 %v1046_v26 }
  0xf7   : > { %2103 = vmatmul.mubr.msk.f32.vlgmr.msra.gmra.mrb[2].mxu0 %vm1055_vm8, %v2101_v24 }
  0xf8   : > { %1671 = vmatprep.mubr.f32.mxu0 %v3390_v22 }
 0x1b7   : > { %v1125_v42 = vpop.f32.mrb[0].mxu0 }
 0x1b8   : > { %v1126_v54 = vadd.f32 %v1125_v42, %v1053_v21  ;;  %v1127_v63 = vpop.f32.mrb[1].mxu0  ;;  %v1210_v7 = vpop.f32.mrb[0].mxu1  ;;  %v3395_v42 = vld [vmem:[#allocation11_spill] sm:$0xff] }
 0x1b9   : > { %v1128_v19 = vadd.f32 %v1127_v63, %v1053_v21  ;;  %v1211_v18 = vadd.f32 %v1210_v7, %v1139_v8  ;;  %v1212_v59 = vpop.f32.mrb[1].mxu1  ;;  %v3396_v63 = vld [vmem:[#allocation12_spill] sm:$0xff] }
 0x1ba   : > { %v1130_v45 = vmax.f32 %v1126_v54, 0.0  ;;  %v1213_v49 = vadd.f32 %v1212_v59, %v1139_v8  ;;  %v3398_v59 = vld [vmem:[#allocation14_spill] sm:$0xff] }
 0x1bb   : > { %v1215_v48 = vmax.f32 %v1211_v18, 0.0  ;;  %v1131_v3 = vmax.f32 %v1128_v19, 0.0  ;;  %v3397_v19 = vld [vmem:[#allocation13_spill] sm:$0xff] }
 0x1bc   : > { %v1216_v50 = vmax.f32 %v1213_v49, 0.0 }
 0x1bd   : > { %v2166_v25 = vpack.c.bf16 %v1215_v48, %v1130_v45 }
 0x1be   : > { %v2164_v31 = vpack.c.bf16 %v1216_v50, %v1131_v3 }
 0x1c0   : > { %2165 = vmatprep.subr.bf16.mxu1 %v2164_v31 }
 0x1c1   : > { %2167 = vmatpush1.bf16.msra.mxu1 %v2166_v25 }
 0x1ca   : > { %v1295_v32 = vpop.f32.mrb[2].mxu0 }
 0x1cb   : > { %v1296_v60 = vadd.f32 %v1295_v32, %v1224_v12  ;;  %v1297_v55 = vpop.f32.mrb[3].mxu0 }
 0x1cc   : > { %v1298_v5 = vadd.f32 %v1297_v55, %v1224_v12  ;;  %v3399_v12 = vld [vmem:[#allocation15_spill] sm:$0xff] }
 0x1cd   : > { %v1300_v1 = vmax.f32 %v1296_v60, 0.0  ;;  %v3400_v60 = vld [vmem:[#allocation16_spill] sm:$0xff] }
 0x1ce   : > { %v1301_v6 = vmax.f32 %v1298_v5, 0.0 }
 0x1d0   : > { %1317 = vmatprep.subr.mxu1 %v1301_v6 }
 0x1d1   : > { %1318 = vmatpush1.msra.mxu1 %v1300_v1 }
 0x1d2   : > { %2104 = vmatmul.mubr.msk.f32.vlgmr.msra.gmra.mrb[2].mxu1 %vm1309_vm9, %v1302_v10 }
 0x1d3   : > { %1522 = vmatprep.mubr.f32.mxu1 %v3390_v22 }
 0x2a5   : > { %v1379_v44 = vpop.f32.mrb[2].mxu1 }
 0x2a6   : > { %v2969_v33 = vadd.f32 %v1379_v44, %v1307_v15  ;;  %v1381_v46 = vpop.f32.mrb[3].mxu1 }
 0x2a7   : > { %v1382_v27 = vadd.f32 %v1381_v46, %v1307_v15 }
 0x2a8   : > { %1386 = vrot.lane.b32.xlu1 %v2969_v33, %s2266_s28 }
 0x2a9   : > { %1388 = vrot.lane.b32.xlu0 %v1382_v27, %s2266_s28 }
 0x2ac   : > { %1394 = vrot.lane.b32.xlu1 %v2969_v33, %s2267_s29 }
 0x2ad   : > { %1396 = vrot.lane.b32.xlu0 %v1382_v27, %s2267_s29 }
 0x2b0   : > { %1402 = vrot.lane.b32.xlu1 %v2969_v33, %s2268_s30 }
 0x2b1   : > { %1404 = vrot.lane.b32.xlu0 %v1382_v27, %s2268_s30 }
 0x2b4   : > { %1410 = vrot.lane.b32.xlu1 %v2969_v33, %s2269_s12 }
 0x2b5   : > { %1412 = vrot.lane.b32.xlu0 %v1382_v27, %s2269_s12 }
 0x2b8   : > { %1418 = vrot.lane.b32.xlu1 %v2969_v33, %s2270_s13 }
 0x2b9   : > { %1420 = vrot.lane.b32.xlu0 %v1382_v27, %s2270_s13 }
 0x2bc   : > { %1426 = vrot.lane.b32.xlu1 %v2969_v33, %s2271_s14 }
 0x2bd   : > { %1428 = vrot.lane.b32.xlu0 %v1382_v27, %s2271_s14 }
 0x2c0   : > { %1434 = vrot.lane.b32.xlu1 %v2969_v33, %s2272_s15 }
 0x2c1   : > { %1436 = vrot.lane.b32.xlu0 %v1382_v27, %s2272_s15 }
 0x2c4   : > { %1442 = vrot.lane.b32.xlu1 %v2969_v33, %s2273_s16 }
 0x2c5   : > { %1444 = vrot.lane.b32.xlu0 %v1382_v27, %s2273_s16 }
 0x2c8   : > { %1452 = vperm.xlu1 %2252, %v1385_v30  }
 0x31a   : > { %v1387_v57 = vpop.permute.xlu1 %1386 }
 0x31b   : > { %v1389_v58 = vpop.permute.xlu0 %1388 }
 0x31c   : > { %v1390_v4 = vsel %vm435_vm0, %v1387_v57, %v1389_v58  ;;  %v1391_v56 = vsel %vm435_vm0, %v1389_v58, %v1387_v57 }
 0x31d   : > { %v1392_v37 = vmul.f32 %v1391_v56, %v3391_v11  ;;  %v1393_v47 = vmul.f32 %v1390_v4, %v3392_v41 }
 0x31e   : > { %v1395_v52 = vpop.permute.xlu1 %1394 }
 0x31f   : > { %v1397_v35 = vpop.permute.xlu0 %1396 }
 0x320   : > { %v1398_v43 = vsel %vm516_vm1, %v1395_v52, %v1397_v35  ;;  %v1399_v39 = vsel %vm516_vm1, %v1397_v35, %v1395_v52 }
 0x321   : > { %v1400_v62 = vmul.f32 %v1399_v39, %v3393_v14  ;;  %v1401_v36 = vmul.f32 %v1398_v43, %v3394_v13 }
 0x322   : > { %v1403_v51 = vpop.permute.xlu1 %1402 }
 0x323   : > { %v2170_v38 = vpack.c.bf16 %v1400_v62, %v1392_v37  ;;  %v1405_v40 = vpop.permute.xlu0 %1404  ;;  %v2168_v61 = vpack.c.bf16 %v1401_v36, %v1393_v47 }
 0x324   : > { %v1406_v28 = vsel %vm586_vm2, %v1403_v51, %v1405_v40  ;;  %v1407_v53 = vsel %vm586_vm2, %v1405_v40, %v1403_v51  ;;  %v1384_v51 = vld [vmem:[%s3317_s7] sm:$0xff] }
 0x325   : > { %2169 = vmatprep.subr.bf16.mxu1 %v2168_v61  ;;  %v1408_v54 = vmul.f32 %v1407_v53, %v3395_v42  ;;  %v1409_v7 = vmul.f32 %v1406_v28, %v3396_v63 }
 0x326   : > { %2171 = vmatpush1.bf16.msra.mxu1 %v2170_v38  ;;  %v1411_v26 = vpop.permute.xlu1 %1410 }
 0x327   : > { %v1413_v24 = vpop.permute.xlu0 %1412 }
 0x328   : > { %v1414_v21 = vsel %vm656_vm3, %v1411_v26, %v1413_v24  ;;  %v1415_v8 = vsel %vm656_vm3, %v1413_v24, %v1411_v26 }
 0x329   : > { %v1416_v18 = vmul.f32 %v1415_v8, %v3397_v19  ;;  %v1417_v45 = vmul.f32 %v1414_v21, %v3398_v59  ;;  %v2107_v21 = vld [vmem:[%s3318_s8 + $0x8] sm:$0xff] }
 0x32a   : > { %v1419_v49 = vpop.permute.xlu1 %1418 }
 0x32b   : > { %v2174_v48 = vpack.c.bf16 %v1416_v18, %v1408_v54  ;;  %v1421_v3 = vpop.permute.xlu0 %1420  ;;  %v2172_v50 = vpack.c.bf16 %v1417_v45, %v1409_v7 }
 0x32c   : > { %v1422_v25 = vsel %vm772_vm4, %v1419_v49, %v1421_v3  ;;  %v1423_v31 = vsel %vm772_vm4, %v1421_v3, %v1419_v49 }
 0x32d   : > { %v1424_v32 = vmul.f32 %v1422_v25, %v3399_v12  ;;  %v1425_v55 = vmul.f32 %v1423_v31, %v3400_v60  ;;  %2173 = vmatprep.subr.bf16.mxu1 %v2172_v50 }
 0x32e   : > { %2175 = vmatpush1.bf16.msra.mxu1 %v2174_v48  ;;  %v1427_v5 = vpop.permute.xlu1 %1426 }
 0x32f   : > { %v2178_v6 = vpack.c.bf16 %v1424_v32, %v2969_v33  ;;  %v1429_v1 = vpop.permute.xlu0 %1428  ;;  %v2176_v10 = vpack.c.bf16 %v1425_v55, %v1382_v27 }
 0x330   : > { %v1430_v15 = vsel %vm842_vm5, %v1427_v5, %v1429_v1  ;;  %v1431_v44 = vsel %vm842_vm5, %v1429_v1, %v1427_v5 }
 0x331   : > { %2177 = vmatprep.subr.bf16.mxu1 %v2176_v10  ;;  %v1432_v33 = vmul.f32 %v1430_v15, %v2522_v0  ;;  %v1433_v27 = vmul.f32 %v1431_v44, %v2525_v2 }
 0x332   : > { %2179 = vmatpush1.bf16.msra.mxu1 %v2178_v6  ;;  %v1435_v46 = vpop.permute.xlu1 %1434 }
 0x333   : > { %v1437_v30 = vpop.permute.xlu0 %1436 }
 0x334   : > { %v1438_v57 = vsel %vm912_vm6, %v1435_v46, %v1437_v30  ;;  %v1439_v58 = vsel %vm912_vm6, %v1437_v30, %v1435_v46 }
 0x335   : > { %v1440_v4 = vmul.f32 %v1438_v57, %v2546_v16  ;;  %v1441_v56 = vmul.f32 %v1439_v58, %v2549_v17 }
 0x336   : > { %v1443_v52 = vpop.permute.xlu1 %1442 }
 0x337   : > { %v2182_v35 = vpack.c.bf16 %v1440_v4, %v1432_v33  ;;  %v1445_v43 = vpop.permute.xlu0 %1444  ;;  %v2180_v39 = vpack.c.bf16 %v1441_v56, %v1433_v27 }
 0x338   : > { %v1447_v37 = vsel %vm982_vm7, %v1445_v43, %v1443_v52  ;;  %v1446_v47 = vsel %vm982_vm7, %v1443_v52, %v1445_v43 }
 0x339   : > { %v1449_v62 = vmul.f32 %v1447_v37, %v2569_v23  ;;  %2181 = vmatprep.subr.bf16.mxu1 %v2180_v39  ;;  %v1448_v36 = vmul.f32 %v1446_v47, %v2558_v29 }
 0x33a   : > { %2183 = vmatpush1.bf16.msra.mxu1 %v2182_v35 }
 0x33b   : > { %1474 = vmatprep.subr.mxu1 %v1449_v62 }
 0x33e   : > { %1475 = vmatpush1.msra.mxu1 %v1448_v36 }
 0x33f   : > { %2105 = vmatmul.mubr.msk.f32.vlgmr.msra.gmra.mrb[4].mxu1 %vm1055_vm8, %v1384_v51 }
 0x340   : > { %1820 = vmatprep.mubr.f32.mxu1 %v3390_v22 }
 0x347   : > { %v1453_v38 = vpop.permute.xlu1 %1452 }
 0x412   : > { %v1524_v40 = vpop.f32.mrb[4].mxu1 }
 0x413   : > { %v1525_v61 = vadd.f32 %v1524_v40, %v1453_v38  ;;  %v1526_v28 = vpop.f32.mrb[5].mxu1 }
 0x414   : > { %v1527_v53 = vadd.f32 %v1526_v28, %v1453_v38 }
 0x415   : > { %v3052_v26 = vmax.f32 %v1525_v61, 0.0 }
 0x416   : > { %v1530_v24 = vmax.f32 %v1527_v53, 0.0 }
 0x417   : > { %1535 = vrot.lane.b32.xlu0 %v3052_v26, %s2266_s28 }
 0x418   : > { %1537 = vrot.lane.b32.xlu1 %v1530_v24, %s2266_s28 }
 0x41b   : > { %1543 = vrot.lane.b32.xlu0 %v3052_v26, %s2267_s29 }
 0x41c   : > { %1545 = vrot.lane.b32.xlu1 %v1530_v24, %s2267_s29 }
 0x41f   : > { %1551 = vrot.lane.b32.xlu0 %v3052_v26, %s2268_s30 }
 0x420   : > { %1553 = vrot.lane.b32.xlu1 %v1530_v24, %s2268_s30 }
 0x423   : > { %1559 = vrot.lane.b32.xlu0 %v3052_v26, %s2269_s12 }
 0x424   : > { %1561 = vrot.lane.b32.xlu1 %v1530_v24, %s2269_s12 }
 0x427   : > { %1567 = vrot.lane.b32.xlu0 %v3052_v26, %s2270_s13 }
 0x428   : > { %1569 = vrot.lane.b32.xlu1 %v1530_v24, %s2270_s13 }
 0x42b   : > { %1575 = vrot.lane.b32.xlu0 %v3052_v26, %s2271_s14 }
 0x42c   : > { %1577 = vrot.lane.b32.xlu1 %v1530_v24, %s2271_s14 }
 0x42f   : > { %1583 = vrot.lane.b32.xlu0 %v3052_v26, %s2272_s15 }
 0x430   : > { %1585 = vrot.lane.b32.xlu1 %v1530_v24, %s2272_s15 }
 0x433   : > { %1591 = vrot.lane.b32.xlu0 %v3052_v26, %s2273_s16 }
 0x434   : > { %1593 = vrot.lane.b32.xlu1 %v1530_v24, %s2273_s16 }
 0x437   : > { %1601 = vperm.xlu0 %2251, %v2107_v21  }
 0x489   : > { %v1536_v8 = vpop.permute.xlu0 %1535 }
 0x48a   : > { %v1538_v54 = vpop.permute.xlu1 %1537 }
 0x48b   : > { %v1539_v7 = vsel %vm435_vm0, %v1536_v8, %v1538_v54  ;;  %v1540_v18 = vsel %vm435_vm0, %v1538_v54, %v1536_v8 }
 0x48c   : > { %v1541_v50 = vmul.f32 %v1540_v18, %v3391_v11  ;;  %v1542_v25 = vmul.f32 %v1539_v7, %v3392_v41 }
 0x48d   : > { %v1544_v45 = vpop.permute.xlu0 %1543 }
 0x48e   : > { %v1546_v49 = vpop.permute.xlu1 %1545 }
 0x48f   : > { %v1547_v48 = vsel %vm516_vm1, %v1544_v45, %v1546_v49  ;;  %v1548_v3 = vsel %vm516_vm1, %v1546_v49, %v1544_v45 }
 0x490   : > { %v1549_v31 = vmul.f32 %v1548_v3, %v3393_v14  ;;  %v1550_v32 = vmul.f32 %v1547_v48, %v3394_v13 }
 0x491   : > { %v1552_v55 = vpop.permute.xlu0 %1551 }
 0x492   : > { %v2186_v5 = vpack.c.bf16 %v1549_v31, %v1541_v50  ;;  %v1554_v6 = vpop.permute.xlu1 %1553  ;;  %v2184_v1 = vpack.c.bf16 %v1550_v32, %v1542_v25 }
 0x493   : > { %v1555_v10 = vsel %vm586_vm2, %v1552_v55, %v1554_v6  ;;  %v1556_v15 = vsel %vm586_vm2, %v1554_v6, %v1552_v55  ;;  %v2106_v55 = vld [vmem:[%s3317_s7 + $0x8] sm:$0xff] }
 0x494   : > { %2185 = vmatprep.subr.bf16.mxu0 %v2184_v1  ;;  %v1557_v58 = vmul.f32 %v1556_v15, %v3395_v42  ;;  %v1558_v33 = vmul.f32 %v1555_v10, %v3396_v63 }
 0x495   : > { %2187 = vmatpush1.bf16.msra.mxu0 %v2186_v5  ;;  %v1560_v44 = vpop.permute.xlu0 %1559 }
 0x496   : > { %v1562_v46 = vpop.permute.xlu1 %1561 }
 0x497   : > { %v1563_v30 = vsel %vm656_vm3, %v1560_v44, %v1562_v46  ;;  %v1564_v57 = vsel %vm656_vm3, %v1562_v46, %v1560_v44 }
 0x498   : > { %v1565_v27 = vmul.f32 %v1564_v57, %v3397_v19  ;;  %v1566_v4 = vmul.f32 %v1563_v30, %v3398_v59 }
 0x499   : > { %v1568_v56 = vpop.permute.xlu0 %1567 }
 0x49a   : > { %v2190_v52 = vpack.c.bf16 %v1565_v27, %v1557_v58  ;;  %v1570_v35 = vpop.permute.xlu1 %1569  ;;  %v2188_v43 = vpack.c.bf16 %v1566_v4, %v1558_v33 }
 0x49b   : > { %v1571_v39 = vsel %vm772_vm4, %v1568_v56, %v1570_v35  ;;  %v1572_v37 = vsel %vm772_vm4, %v1570_v35, %v1568_v56 }
 0x49c   : > { %v1573_v47 = vmul.f32 %v1571_v39, %v3399_v12  ;;  %v1574_v62 = vmul.f32 %v1572_v37, %v3400_v60  ;;  %2189 = vmatprep.subr.bf16.mxu0 %v2188_v43 }
 0x49d   : > { %2191 = vmatpush1.bf16.msra.mxu0 %v2190_v52  ;;  %v1576_v36 = vpop.permute.xlu0 %1575 }
 0x49e   : > { %v2194_v51 = vpack.c.bf16 %v1573_v47, %v3052_v26  ;;  %v1578_v38 = vpop.permute.xlu1 %1577  ;;  %v2192_v40 = vpack.c.bf16 %v1574_v62, %v1530_v24 }
 0x49f   : > { %v1579_v61 = vsel %vm842_vm5, %v1576_v36, %v1578_v38  ;;  %v1580_v28 = vsel %vm842_vm5, %v1578_v38, %v1576_v36 }
 0x4a0   : > { %2193 = vmatprep.subr.bf16.mxu0 %v2192_v40  ;;  %v1581_v26 = vmul.f32 %v1579_v61, %v2522_v0  ;;  %v1582_v24 = vmul.f32 %v1580_v28, %v2525_v2 }
 0x4a1   : > { %2195 = vmatpush1.bf16.msra.mxu0 %v2194_v51  ;;  %v1584_v53 = vpop.permute.xlu0 %1583 }
 0x4a2   : > { %v1586_v21 = vpop.permute.xlu1 %1585 }
 0x4a3   : > { %v1587_v8 = vsel %vm912_vm6, %v1584_v53, %v1586_v21  ;;  %v1588_v54 = vsel %vm912_vm6, %v1586_v21, %v1584_v53 }
 0x4a4   : > { %v1589_v7 = vmul.f32 %v1587_v8, %v2546_v16  ;;  %v1590_v18 = vmul.f32 %v1588_v54, %v2549_v17 }
 0x4a5   : > { %v1592_v45 = vpop.permute.xlu0 %1591 }
 0x4a6   : > { %v2198_v49 = vpack.c.bf16 %v1589_v7, %v1581_v26  ;;  %v1594_v48 = vpop.permute.xlu1 %1593  ;;  %v2196_v3 = vpack.c.bf16 %v1590_v18, %v1582_v24 }
 0x4a7   : > { %v1596_v50 = vsel %vm982_vm7, %v1594_v48, %v1592_v45  ;;  %v1595_v25 = vsel %vm982_vm7, %v1592_v45, %v1594_v48 }
 0x4a8   : > { %v1598_v31 = vmul.f32 %v1596_v50, %v2569_v23  ;;  %2197 = vmatprep.subr.bf16.mxu0 %v2196_v3  ;;  %v1597_v32 = vmul.f32 %v1595_v25, %v2558_v29 }
 0x4a9   : > { %2199 = vmatpush1.bf16.msra.mxu0 %v2198_v49 }
 0x4aa   : > { %1623 = vmatprep.subr.mxu0 %v1598_v31 }
 0x4ad   : > { %1624 = vmatpush1.msra.mxu0 %v1597_v32 }
 0x4ae   : > { %2108 = vmatmul.mubr.msk.f32.vlgmr.msra.gmra.mrb[4].mxu0 %vm1055_vm8, %v2106_v55 }
 0x4af   : > { %1971 = vmatprep.mubr.f32.mxu0 %v3390_v22  ;;  %v2110_v22 = vld [vmem:[%s3318_s8 + $0x10] sm:$0xff] }
 0x4b6   : > { %v1602_v5 = vpop.permute.xlu0 %1601 }
 0x581   : > { %v1673_v6 = vpop.f32.mrb[4].mxu0 }
 0x582   : > { %v1674_v1 = vadd.f32 %v1673_v6, %v1602_v5  ;;  %v1675_v10 = vpop.f32.mrb[5].mxu0 }
 0x583   : > { %v1676_v15 = vadd.f32 %v1675_v10, %v1602_v5 }
 0x584   : > { %v3135_v44 = vmax.f32 %v1674_v1, 0.0 }
 0x585   : > { %v1679_v46 = vmax.f32 %v1676_v15, 0.0 }
 0x586   : > { %1684 = vrot.lane.b32.xlu1 %v3135_v44, %s2266_s28 }
 0x587   : > { %1686 = vrot.lane.b32.xlu0 %v1679_v46, %s2266_s28 }
 0x58a   : > { %1692 = vrot.lane.b32.xlu1 %v3135_v44, %s2267_s29 }
 0x58b   : > { %1694 = vrot.lane.b32.xlu0 %v1679_v46, %s2267_s29 }
 0x58e   : > { %1700 = vrot.lane.b32.xlu1 %v3135_v44, %s2268_s30 }
 0x58f   : > { %1702 = vrot.lane.b32.xlu0 %v1679_v46, %s2268_s30 }
 0x592   : > { %1708 = vrot.lane.b32.xlu1 %v3135_v44, %s2269_s12 }
 0x593   : > { %1710 = vrot.lane.b32.xlu0 %v1679_v46, %s2269_s12 }
 0x596   : > { %1716 = vrot.lane.b32.xlu1 %v3135_v44, %s2270_s13 }
 0x597   : > { %1718 = vrot.lane.b32.xlu0 %v1679_v46, %s2270_s13 }
 0x59a   : > { %1724 = vrot.lane.b32.xlu1 %v3135_v44, %s2271_s14 }
 0x59b   : > { %1726 = vrot.lane.b32.xlu0 %v1679_v46, %s2271_s14 }
 0x59e   : > { %1732 = vrot.lane.b32.xlu1 %v3135_v44, %s2272_s15 }
 0x59f   : > { %1734 = vrot.lane.b32.xlu0 %v1679_v46, %s2272_s15 }
 0x5a2   : > { %1740 = vrot.lane.b32.xlu1 %v3135_v44, %s2273_s16 }
 0x5a3   : > { %1742 = vrot.lane.b32.xlu0 %v1679_v46, %s2273_s16 }
 0x5a6   : > { %1750 = vperm.xlu1 %2252, %v2110_v22  }
 0x5f8   : > { %v1685_v30 = vpop.permute.xlu1 %1684 }
 0x5f9   : > { %v1687_v57 = vpop.permute.xlu0 %1686 }
 0x5fa   : > { %v1688_v58 = vsel %vm435_vm0, %v1685_v30, %v1687_v57  ;;  %v1689_v33 = vsel %vm435_vm0, %v1687_v57, %v1685_v30 }
 0x5fb   : > { %v1690_v35 = vmul.f32 %v1689_v33, %v3391_v11  ;;  %v1691_v43 = vmul.f32 %v1688_v58, %v3392_v41 }
 0x5fc   : > { %v1693_v27 = vpop.permute.xlu1 %1692 }
 0x5fd   : > { %v1695_v4 = vpop.permute.xlu0 %1694 }
 0x5fe   : > { %v1696_v56 = vsel %vm516_vm1, %v1693_v27, %v1695_v4  ;;  %v1697_v52 = vsel %vm516_vm1, %v1695_v4, %v1693_v27 }
 0x5ff   : > { %v1698_v39 = vmul.f32 %v1697_v52, %v3393_v14  ;;  %v1699_v37 = vmul.f32 %v1696_v56, %v3394_v13 }
 0x600   : > { %v1701_v47 = vpop.permute.xlu1 %1700 }
 0x601   : > { %v2202_v62 = vpack.c.bf16 %v1698_v39, %v1690_v35  ;;  %v1703_v36 = vpop.permute.xlu0 %1702  ;;  %v2200_v51 = vpack.c.bf16 %v1699_v37, %v1691_v43  ;;  %v2109_v37 = vld [vmem:[%s3317_s7 + $0x10] sm:$0xff] }
 0x602   : > { %v1704_v38 = vsel %vm586_vm2, %v1701_v47, %v1703_v36  ;;  %v1705_v40 = vsel %vm586_vm2, %v1703_v36, %v1701_v47 }
 0x603   : > { %2201 = vmatprep.subr.bf16.mxu1 %v2200_v51  ;;  %v1706_v8 = vmul.f32 %v1705_v40, %v3395_v42  ;;  %v1707_v54 = vmul.f32 %v1704_v38, %v3396_v63 }
 0x604   : > { %2203 = vmatpush1.bf16.msra.mxu1 %v2202_v62  ;;  %v1709_v61 = vpop.permute.xlu1 %1708 }
 0x605   : > { %v1711_v28 = vpop.permute.xlu0 %1710 }
 0x606   : > { %v1712_v53 = vsel %vm656_vm3, %v1709_v61, %v1711_v28  ;;  %v1713_v21 = vsel %vm656_vm3, %v1711_v28, %v1709_v61  ;;  %v1830_v28 = vld [vmem:[#allocation2] sm:$0x1] }
 0x607   : > { %v1714_v26 = vmul.f32 %v1713_v21, %v3397_v19  ;;  %v1715_v24 = vmul.f32 %v1712_v53, %v3398_v59 }
 0x608   : > { %v1717_v7 = vpop.permute.xlu1 %1716 }
 0x609   : > { %v2206_v18 = vpack.c.bf16 %v1714_v26, %v1706_v8  ;;  %v1719_v45 = vpop.permute.xlu0 %1718  ;;  %v2204_v49 = vpack.c.bf16 %v1715_v24, %v1707_v54 }
 0x60a   : > { %v1720_v48 = vsel %vm772_vm4, %v1717_v7, %v1719_v45  ;;  %v1721_v3 = vsel %vm772_vm4, %v1719_v45, %v1717_v7 }
 0x60b   : > { %v1722_v50 = vmul.f32 %v1720_v48, %v3399_v12  ;;  %v1723_v25 = vmul.f32 %v1721_v3, %v3400_v60  ;;  %2205 = vmatprep.subr.bf16.mxu1 %v2204_v49 }
 0x60c   : > { %2207 = vmatpush1.bf16.msra.mxu1 %v2206_v18  ;;  %v1725_v31 = vpop.permute.xlu1 %1724 }
 0x60d   : > { %v2210_v32 = vpack.c.bf16 %v1722_v50, %v3135_v44  ;;  %v1727_v55 = vpop.permute.xlu0 %1726  ;;  %v2208_v5 = vpack.c.bf16 %v1723_v25, %v1679_v46 }
 0x60e   : > { %v1728_v6 = vsel %vm842_vm5, %v1725_v31, %v1727_v55  ;;  %v1729_v1 = vsel %vm842_vm5, %v1727_v55, %v1725_v31 }
 0x60f   : > { %2209 = vmatprep.subr.bf16.mxu1 %v2208_v5  ;;  %v1730_v44 = vmul.f32 %v1728_v6, %v2522_v0  ;;  %v1731_v46 = vmul.f32 %v1729_v1, %v2525_v2 }
 0x610   : > { %2211 = vmatpush1.bf16.msra.mxu1 %v2210_v32  ;;  %v1733_v10 = vpop.permute.xlu1 %1732 }
 0x611   : > { %v1735_v15 = vpop.permute.xlu0 %1734 }
 0x612   : > { %v1736_v22 = vsel %vm912_vm6, %v1733_v10, %v1735_v15  ;;  %v1737_v30 = vsel %vm912_vm6, %v1735_v15, %v1733_v10 }
 0x613   : > { %v1738_v57 = vmul.f32 %v1736_v22, %v2546_v16  ;;  %v1739_v58 = vmul.f32 %v1737_v30, %v2549_v17 }
 0x614   : > { %v1741_v33 = vpop.permute.xlu1 %1740 }
 0x615   : > { %v2214_v27 = vpack.c.bf16 %v1738_v57, %v1730_v44  ;;  %v1743_v4 = vpop.permute.xlu0 %1742  ;;  %v2212_v56 = vpack.c.bf16 %v1739_v58, %v1731_v46 }
 0x616   : > { %v1745_v52 = vsel %vm982_vm7, %v1743_v4, %v1741_v33  ;;  %v1744_v35 = vsel %vm982_vm7, %v1741_v33, %v1743_v4 }
 0x617   : > { %v1747_v43 = vmul.f32 %v1745_v52, %v2569_v23  ;;  %2213 = vmatprep.subr.bf16.mxu1 %v2212_v56  ;;  %v1746_v39 = vmul.f32 %v1744_v35, %v2558_v29 }
 0x618   : > { %2215 = vmatpush1.bf16.msra.mxu1 %v2214_v27 }
 0x619   : > { %1772 = vmatprep.subr.mxu1 %v1747_v43 }
 0x61c   : > { %1773 = vmatpush1.msra.mxu1 %v1746_v39 }
 0x61d   : > { %2111 = vmatmul.mubr.msk.f32.vlgmr.msra.gmra.mrb[6].mxu1 %vm1055_vm8, %v2109_v37 }
 0x625   : > { %v1751_v47 = vpop.permute.xlu1 %1750 }
 0x6f0   : > { %v1822_v62 = vpop.f32.mrb[6].mxu1 }
 0x6f1   : > { %v1823_v36 = vadd.f32 %v1822_v62, %v1751_v47  ;;  %v1824_v51 = vpop.f32.mrb[7].mxu1 }
 0x6f2   : > { %v1825_v38 = vadd.f32 %v1824_v51, %v1751_v47 }
 0x6f3   : > { %v3217_v40 = vmax.f32 %v1823_v36, 0.0 }
 0x6f4   : > { %v1828_v61 = vmax.f32 %v1825_v38, 0.0 }
 0x6f5   : > { %1831 = vrot.lane.b32.xlu0 %v3217_v40, %s2266_s28 }
 0x6f6   : > { %1833 = vrot.lane.b32.xlu1 %v1828_v61, %s2266_s28 }
 0x6f9   : > { %1839 = vrot.lane.b32.xlu0 %v3217_v40, %s2267_s29 }
 0x6fa   : > { %1841 = vrot.lane.b32.xlu1 %v1828_v61, %s2267_s29 }
 0x6fd   : > { %1847 = vrot.lane.b32.xlu0 %v3217_v40, %s2268_s30 }
 0x6fe   : > { %1849 = vrot.lane.b32.xlu1 %v1828_v61, %s2268_s30 }
 0x701   : > { %1855 = vrot.lane.b32.xlu0 %v3217_v40, %s2269_s12 }
 0x702   : > { %1857 = vrot.lane.b32.xlu1 %v1828_v61, %s2269_s12 }
 0x705   : > { %1863 = vrot.lane.b32.xlu0 %v3217_v40, %s2270_s13 }
 0x706   : > { %1865 = vrot.lane.b32.xlu1 %v1828_v61, %s2270_s13 }
 0x709   : > { %1871 = vrot.lane.b32.xlu0 %v3217_v40, %s2271_s14 }
 0x70a   : > { %1873 = vrot.lane.b32.xlu1 %v1828_v61, %s2271_s14 }
 0x70d   : > { %1879 = vrot.lane.b32.xlu0 %v3217_v40, %s2272_s15 }
 0x70e   : > { %1881 = vrot.lane.b32.xlu1 %v1828_v61, %s2272_s15 }
 0x711   : > { %1887 = vrot.lane.b32.xlu0 %v3217_v40, %s2273_s16 }
 0x712   : > { %1889 = vrot.lane.b32.xlu1 %v1828_v61, %s2273_s16 }
 0x715   : > { %1897 = vperm.xlu0 %2251, %v1830_v28  }
 0x767   : > { %v1832_v53 = vpop.permute.xlu0 %1831 }
 0x768   : > { %v1834_v21 = vpop.permute.xlu1 %1833 }
 0x769   : > { %v1835_v8 = vsel %vm435_vm0, %v1832_v53, %v1834_v21  ;;  %v1836_v54 = vsel %vm435_vm0, %v1834_v21, %v1832_v53  ;;  %v2257_v21 = vld [vmem:[%s2360_s27] sm:$0x3]  ;;  %s403_s27 = scalar_lea.vmem %s3321_s11, %s2086_s21 }
 0x76a   : > { %v1837_v45 = vmul.f32 %v1836_v54, %v3391_v11  ;;  %v1838_v49 = vmul.f32 %v1835_v8, %v3392_v41  ;;  %v1986_v54 = vrot.slane %v2257_v21, %v3384_v20 }
 0x76b   : > { %v1840_v26 = vpop.permute.xlu0 %1839 }
 0x76c   : > { %v1842_v24 = vpop.permute.xlu1 %1841 }
 0x76d   : > { %v1843_v7 = vsel %vm516_vm1, %v1840_v26, %v1842_v24  ;;  %v1844_v18 = vsel %vm516_vm1, %v1842_v24, %v1840_v26 }
 0x76e   : > { %v1845_v48 = vmul.f32 %v1844_v18, %v3393_v14  ;;  %v1846_v3 = vmul.f32 %v1843_v7, %v3394_v13 }
 0x76f   : > { %v1848_v50 = vpop.permute.xlu0 %1847 }
 0x770   : > { %v2218_v25 = vpack.c.bf16 %v1845_v48, %v1837_v45  ;;  %v1850_v31 = vpop.permute.xlu1 %1849  ;;  %v2216_v32 = vpack.c.bf16 %v1846_v3, %v1838_v49  ;;  %v3401_v49 = vld [vmem:[#allocation5_spill] sm:$0xff] }
 0x771   : > { %v1851_v55 = vsel %vm586_vm2, %v1848_v50, %v1850_v31  ;;  %v1852_v5 = vsel %vm586_vm2, %v1850_v31, %v1848_v50 }
 0x772   : > { %2217 = vmatprep.subr.bf16.mxu0 %v2216_v32  ;;  %v1853_v13 = vmul.f32 %v1852_v5, %v3395_v42  ;;  %v1854_v1 = vmul.f32 %v1851_v55, %v3396_v63 }
 0x773   : > { %2219 = vmatpush1.bf16.msra.mxu0 %v2218_v25  ;;  %v1856_v6 = vpop.permute.xlu0 %1855  ;;  %v3402_v25 = vlaneseq }
 0x774   : > { %v1858_v11 = vpop.permute.xlu1 %1857 }
 0x775   : > { %v1859_v41 = vsel %vm656_vm3, %v1856_v6, %v1858_v11  ;;  %v1860_v14 = vsel %vm656_vm3, %v1858_v11, %v1856_v6  ;;  %vm2011_vm10 = vcmp.lt.s32.totalorder %v3402_v25, 256 }
 0x776   : > { %v1861_v10 = vmul.f32 %v1860_v14, %v3397_v19  ;;  %v1862_v15 = vmul.f32 %v1859_v41, %v3398_v59 }
 0x777   : > { %v1864_v22 = vpop.permute.xlu0 %1863 }
 0x778   : > { %v2222_v30 = vpack.c.bf16 %v1861_v10, %v1853_v13  ;;  %v1866_v44 = vpop.permute.xlu1 %1865  ;;  %v2220_v46 = vpack.c.bf16 %v1862_v15, %v1854_v1 }
 0x779   : > { %v1867_v57 = vsel %vm772_vm4, %v1864_v22, %v1866_v44  ;;  %v1868_v58 = vsel %vm772_vm4, %v1866_v44, %v1864_v22 }
 0x77a   : > { %v1869_v33 = vmul.f32 %v1867_v57, %v3399_v12  ;;  %v1870_v42 = vmul.f32 %v1868_v58, %v3400_v60  ;;  %2221 = vmatprep.subr.bf16.mxu0 %v2220_v46 }
 0x77b   : > { %2223 = vmatpush1.bf16.msra.mxu0 %v2222_v30  ;;  %v1872_v63 = vpop.permute.xlu0 %1871 }
 0x77c   : > { %v2226_v19 = vpack.c.bf16 %v1869_v33, %v3217_v40  ;;  %v1874_v59 = vpop.permute.xlu1 %1873  ;;  %v2224_v27 = vpack.c.bf16 %v1870_v42, %v1828_v61 }
 0x77d   : > { %v1875_v4 = vsel %vm842_vm5, %v1872_v63, %v1874_v59  ;;  %v1876_v56 = vsel %vm842_vm5, %v1874_v59, %v1872_v63 }
 0x77e   : > { %2225 = vmatprep.subr.bf16.mxu0 %v2224_v27  ;;  %v1877_v43 = vmul.f32 %v1875_v4, %v2522_v0  ;;  %v1878_v39 = vmul.f32 %v1876_v56, %v2525_v2  ;;  %v1829_v2 = vld [vmem:[%s3319_s9] sm:$0x1] }
 0x77f   : > { %2227 = vmatpush1.bf16.msra.mxu0 %v2226_v19  ;;  %v1880_v52 = vpop.permute.xlu0 %1879 }
 0x780   : > { %v1882_v35 = vpop.permute.xlu1 %1881 }
 0x781   : > { %v1883_v12 = vsel %vm912_vm6, %v1880_v52, %v1882_v35  ;;  %v1884_v60 = vsel %vm912_vm6, %v1882_v35, %v1880_v52 }
 0x782   : > { %v1885_v37 = vmul.f32 %v1883_v12, %v2546_v16  ;;  %v1886_v47 = vmul.f32 %v1884_v60, %v2549_v17  ;;  %v2276_v17 = vmov 1966171168  }
 0x783   : > { %v1888_v62 = vpop.permute.xlu0 %1887  ;;  %v1995_v53 = vunpack.c.l.s4 %v2276_v17 }
 0x784   : > { %v2230_v36 = vpack.c.bf16 %v1885_v37, %v1877_v43  ;;  %v1890_v51 = vpop.permute.xlu1 %1889  ;;  %v2228_v38 = vpack.c.bf16 %v1886_v47, %v1878_v39 }
 0x785   : > { %v1892_v40 = vsel %vm982_vm7, %v1890_v51, %v1888_v62  ;;  %v1891_v61 = vsel %vm982_vm7, %v1888_v62, %v1890_v51 }
 0x786   : > { %v1894_v28 = vmul.f32 %v1892_v40, %v2569_v23  ;;  %2229 = vmatprep.subr.bf16.mxu0 %v2228_v38  ;;  %v1893_v0 = vmul.f32 %v1891_v61, %v2558_v29  ;;  %v1982_v23 = vrot.slane %v2257_v21, %v2391_v9  ;;  %v1996_v29 = vunpack.c.0.s8 %v1995_v53 }
 0x787   : > { %2231 = vmatpush1.bf16.msra.mxu0 %v2230_v36 }
 0x788   : > { %1923 = vmatprep.subr.mxu0 %v1894_v28  ;;  %v1999_v48 = vsub.s32 %v1996_v29, %v3401_v49 }
 0x78b   : > { %1924 = vmatpush1.msra.mxu0 %v1893_v0 }
 0x78c   : > { %2112 = vmatmul.mubr.msk.f32.vlgmr.msra.gmra.mrb[6].mxu0 %vm1055_vm8, %v1829_v2 }
 0x794   : > { %v1898_v16 = vpop.permute.xlu0 %1897 }
 0x795   : > { %v1903_v34 = vrot.slane %v1898_v16, %v2391_v9 }
 0x85f   : > { %v1973_v8 = vpop.f32.mrb[6].mxu0 }
 0x860   : > { %v1974_v26 = vadd.f32 %v1973_v8, %v1903_v34  ;;  %v1975_v24 = vpop.f32.mrb[7].mxu0 }
 0x861   : > { %v1976_v7 = vadd.f32 %v1975_v24, %v1903_v34 }
 0x862   : > { %v1989_v18 = vadd.f32 %v1982_v23, %v1974_v26 }
 0x863   : > { %v1990_v45 = vadd.f32 %v1986_v54, %v1976_v7 }
 0x865   : > { %v1993_v3 = vcombine.low %v1989_v18, %v1990_v45 }
 0x867   : > { %v2000_v50 = vrot.slane %v1993_v3, %v1999_v48 }
 0x869   : > { %v2007_v9 = vrot.slane %v2000_v50, %v1999_v48 }
 0x86b   : > { %2013 = vst.msk [vmem:[%s403_s27] sm:$0x3] %vm2011_vm10, %v2007_v9 }
 0x86c PF: > { %s23_s19 = sadd.s32 1, %s2264_s19  }
 0x86d   : > { %p20_p4 = scmp.ge.s32.totalorder %s23_s19, 4  }
 0x86f   :  { %22 = sbr.rel (!%p20_p4) target bundleno = 3 (0x3), region = 112 }

</bundles_post_ra>
